<compile_context>
chip_gen: v6e
topology: v6e:2x2x1
jax: 0.10.0
libtpu: 0.0.40
codegen_flags: <defaults>
</compile_context>

<pallas_src>
import math
from functools import partial

import jax
import jax.numpy as jnp
import numpy as np
from jax.experimental import pallas as pl
from jax.experimental.pallas import tpu as pltpu


def _pick_tile(dim, preferred, align):
    """Largest tile <= preferred that divides `dim` and is a multiple of `align`
    (falls back to the full dim, which is always a legal block size)."""
    if dim <= preferred:
        return dim
    t = (preferred // align) * align
    while t >= align:
        if dim % t == 0:
            return t
        t -= align
    return dim


# ------------------------- generic tiled projection --------------------------- #

def _matmul_kernel(x_ref, w_ref, o_ref, acc_ref):
    @pl.when(pl.program_id(2) == 0)
    def _():
        acc_ref[...] = jnp.zeros(acc_ref.shape, dtype=acc_ref.dtype)
    # bf16 MXU inputs, f32 accumulation.
    acc_ref[...] += jnp.dot(x_ref[...].astype(jnp.bfloat16),
                            w_ref[...].astype(jnp.bfloat16),
                            preferred_element_type=jnp.float32)

    @pl.when(pl.program_id(2) == pl.num_programs(2) - 1)
    def _():
        o_ref[...] = acc_ref[...].astype(o_ref.dtype)


def linear(x, w_t, *, out_dtype=None, tm=256, tn=512, tk=512):
    """y = x @ w_t with x: (..., Hin), w_t: (Hin, Hout). Rows x cols x k tiled."""
    out_dtype = out_dtype or x.dtype
    lead = x.shape[:-1]
    Hin = x.shape[-1]
    Hout = w_t.shape[1]
    x2 = x.reshape(-1, Hin)                  # flatten batch*seq into the row axis
    R = x2.shape[0]
    tm = _pick_tile(R, tm, 16)               # 16: bf16 sublane alignment
    tn = _pick_tile(Hout, tn, 128)
    tk = _pick_tile(Hin, tk, 128)
    out = pl.pallas_call(
        _matmul_kernel,
        out_shape=jax.ShapeDtypeStruct((R, Hout), out_dtype),
        grid=(R // tm, Hout // tn, Hin // tk),
        in_specs=[
            pl.BlockSpec((tm, tk), lambda i, j, k: (i, k)),
            pl.BlockSpec((tk, tn), lambda i, j, k: (k, j)),
        ],
        out_specs=pl.BlockSpec((tm, tn), lambda i, j, k: (i, j)),
        scratch_shapes=[pltpu.VMEM((tm, tn), jnp.float32)],
        compiler_params=pltpu.CompilerParams(
            dimension_semantics=("parallel", "parallel", "arbitrary"),
            vmem_limit_bytes=32 * 1024 * 1024),
    )(x2, w_t)
    return out.reshape(*lead, Hout)


# ------------------ attention + fused output projection kernel ---------------- #

def _attn_out_kernel(q_ref, k_ref, v_ref, mask_ref, wo_ref, o_ref,
                     m_ref, l_ref, acc_ref, *, num_heads, head_dim):
    K, D = num_heads, head_dim
    kv = pl.program_id(2)

    @pl.when(kv == 0)
    def _():
        m_ref[...] = jnp.full(m_ref.shape, -jnp.inf, dtype=m_ref.dtype)
        l_ref[...] = jnp.zeros(l_ref.shape, dtype=l_ref.dtype)
        acc_ref[...] = jnp.zeros(acc_ref.shape, dtype=acc_ref.dtype)

    # Static unroll over heads; per-head slices are taken straight from the refs
    # (free static lane slices) and per-head state lives in VMEM scratch, so the
    # (qt, lt) score/p temporaries of one head die before the next head starts.
    for h in range(K):
        sl = slice(h * D, (h + 1) * D)
        s = jax.lax.dot_general(
            q_ref[:, sl], k_ref[:, sl], (((1,), (1,)), ((), ())),
            preferred_element_type=jnp.float32)               # (qt, lt) f32 scores
        m_prev = m_ref[h]                                     # (qt, 1)
        m_new = jnp.maximum(m_prev, jnp.max(s, axis=-1, keepdims=True))
        alpha = jnp.exp(m_prev - m_new)                       # f32 (v5e: no bf16 EUP)
        p = jnp.exp(s - m_new)                                # UNMASKED exp
        # Denominator: unmasked sum over all keys (torch: softmax THEN mask).
        l_ref[h] = alpha * l_ref[h] + jnp.sum(p, axis=-1, keepdims=True)
        # Numerator: post-softmax adaptive-span mask, then bf16 for the MXU.
        pm = (p * mask_ref[h]).astype(jnp.bfloat16)           # (1, lt) broadcast
        acc_ref[:, sl] = alpha * acc_ref[:, sl] + jnp.dot(
            pm, v_ref[:, sl], preferred_element_type=jnp.float32)
        m_ref[h] = m_new

    @pl.when(kv == pl.num_programs(2) - 1)
    def _():
        # Normalize each head slice in the lane-dense (qt, H) accumulator slab.
        # Exact divide: runs once per q-tile, essentially free vs approx.
        for h in range(K):
            sl = slice(h * D, (h + 1) * D)
            acc_ref[:, sl] = acc_ref[:, sl] / l_ref[h]
        # Fused output projection: (qt, H) @ (H, H) with wo resident in VMEM.
        o_ref[...] = jnp.dot(acc_ref[...].astype(jnp.bfloat16),
                             wo_ref[...].astype(jnp.bfloat16),
                             preferred_element_type=jnp.float32).astype(o_ref.dtype)


def attention_with_out_proj(q, k, v, mask, wo_t, *, num_heads, out_dtype):
    """q: (B,M,H) (scale folded into wq), k/v: (B,L,H), mask: (K,1,L), wo_t: (H,H).

    Returns the already output-projected (B, M, H) tensor.
    Tile defaults target v6e; on v7x prefer a smaller lt before shrinking qt, on
    v5e/v6e qt/lt and vmem_limit_bytes can be grown to cut K/V re-streaming.
    """
    B, M, H = q.shape
    L = k.shape[1]
    K = num_heads
    D = H // K
    qt = _pick_tile(M, 256, 16)      # 16: bf16 sublane alignment
    lt = _pick_tile(L, 512, 128)
    return pl.pallas_call(
        partial(_attn_out_kernel, num_heads=K, head_dim=D),
        out_shape=jax.ShapeDtypeStruct((B, M, H), out_dtype),
        grid=(B, M // qt, L // lt),
        in_specs=[
            pl.BlockSpec((None, qt, H), lambda b, qi, ki: (b, qi, 0)),
            pl.BlockSpec((None, lt, H), lambda b, qi, ki: (b, ki, 0)),
            pl.BlockSpec((None, lt, H), lambda b, qi, ki: (b, ki, 0)),
            # Tiny (K,1,lt) mask slice per kv step (keeps lane slicing static).
            pl.BlockSpec((K, 1, lt), lambda b, qi, ki: (0, 0, ki)),
            # Output-projection weight kept resident (constant block index).
            pl.BlockSpec((H, H), lambda b, qi, ki: (0, 0)),
        ],
        out_specs=pl.BlockSpec((None, qt, H), lambda b, qi, ki: (b, qi, 0)),
        scratch_shapes=[
            pltpu.VMEM((K, qt, 1), jnp.float32),   # running max per head
            pltpu.VMEM((K, qt, 1), jnp.float32),   # running UNMASKED denominator
            pltpu.VMEM((qt, H), jnp.float32),      # lane-dense masked-numerator slab
        ],
        compiler_params=pltpu.CompilerParams(
            dimension_semantics=("parallel", "parallel", "arbitrary"),
            vmem_limit_bytes=32 * 1024 * 1024),
    )(q, k, v, mask, wo_t)


# ------------------------------- glue (JAX) ---------------------------------- #

def adaptive_mask(current_val, max_size, ramp_size, L):
    """AdaptiveMask.forward mask construction. current_val: (K,1,1) -> (K,1,L)."""
    template = jnp.linspace(1.0 - max_size, 0.0, max_size, dtype=jnp.float32)
    m = template[None, None, :] + current_val * max_size        # (K,1,max_size)
    m = m / ramp_size + 1.0
    m = jnp.clip(m, 0.0, 1.0)
    if L < max_size:
        m = m[:, :, -L:]
    return m


def prepare_params(raw, hidden_size):
    """One-time parameter prep (outside jit): fold 1/sqrt(H) into wq, cast to bf16."""
    scale = 1.0 / math.sqrt(hidden_size)
    return {
        "wq_t": (raw["wq_t"] * scale).astype(jnp.bfloat16),
        "wk_t": raw["wk_t"].astype(jnp.bfloat16),
        "wv_t": raw["wv_t"].astype(jnp.bfloat16),
        "wo_t": raw["wo_t"].astype(jnp.bfloat16),
        "span_val": raw["span_val"],
    }


def multi_head_seq_attention(params, query, key, value, key_pe, *,
                             num_heads, attn_span, ramp):
    del key_pe  # unused (see TODO(synk) at top of file)
    L = key.shape[1]
    # Projections via the tiled matmul kernel; bf16 activations halve HBM traffic
    # into the attention kernel. (1/sqrt(H) already folded into wq_t.)
    q = linear(query, params["wq_t"], out_dtype=jnp.bfloat16)
    k = linear(key, params["wk_t"], out_dtype=jnp.bfloat16)
    v = linear(value, params["wv_t"], out_dtype=jnp.bfloat16)
    mask = adaptive_mask(params["span_val"], attn_span, ramp, L)    # (K,1,L) f32
    # Attention + fused output projection -> final (B, M, H) in the input dtype.
    return attention_with_out_proj(q, k, v, mask, params["wo_t"],
                                   num_heads=num_heads, out_dtype=query.dtype)


def reference_forward(params, query, key, value, *, num_heads, attn_span, ramp):
    """Pure-JAX reference of the same forward pass (f32 params, default precision)."""
    B, M, H = query.shape
    K = num_heads
    D = H // K
    L = key.shape[1]

    q = jnp.einsum("bsh,hg->bsg", query, params["wq_t"])
    v = jnp.einsum("bsh,hg->bsg", value, params["wv_t"])
    k = jnp.einsum("bsh,hg->bsg", key, params["wk_t"])

    def split(x):
        b, s, _ = x.shape
        return x.reshape(b, s, K, D).transpose(0, 2, 1, 3)

    qh, kh, vh = split(q), split(k), split(v)
    s = jnp.einsum("bkmd,bknd->bkmn", qh, kh) / math.sqrt(H)
    p = jax.nn.softmax(s, axis=-1)
    mask = adaptive_mask(params["span_val"], attn_span, ramp, L)   # (K,1,L)
    p = p * mask[None]
    o = jnp.einsum("bkmn,bknd->bkmd", p, vh)
    o = o.transpose(0, 2, 1, 3).reshape(B, M, H)
    return jnp.einsum("bmh,hg->bmg", o, params["wo_t"])


# ---------------------------------- main ------------------------------------- #

if __name__ == "__main__":
    B, M, L = 2, 8, 16          # batch, query len, key/value len
    H, K = 32, 4                # hidden_size, num_attention_heads
    attn_span = 16              # config.attn_span (== max mask size)
    ramp = 4                    # config.adapt_span_ramp
    span_init = 0.5             # config.adapt_span_init

    rng = jax.random.PRNGKey(0)
    ks = jax.random.split(rng, 8)
    bound = 1.0 / math.sqrt(H)  # torch nn.Linear default init range

    def init_w(k):
        # torch weight is (H_out, H_in); we store its transpose (H_in, H_out).
        return jax.random.uniform(k, (H, H), jnp.float32, -bound, bound).T

    raw_params = {
        "wq_t": init_w(ks[0]),
        "wk_t": init_w(ks[1]),
        "wv_t": init_w(ks[2]),
        "wo_t": init_w(ks[3]),
        "span_val": jnp.full((K, 1, 1), span_init, jnp.float32),  # AdaptiveMask.current_val
    }
    params = prepare_params(raw_params, H)   # fold q scale + bf16 cast, once

    query = jax.random.normal(ks[4], (B, M, H), jnp.float32)
    key   = jax.random.normal(ks[5], (B, L, H), jnp.float32)
    value = jax.random.normal(ks[6], (B, L, H), jnp.float32)
    key_pe = jax.random.normal(ks[7], (1, L, H), jnp.float32)

    fwd = jax.jit(partial(multi_head_seq_attention,
                          num_heads=K, attn_span=attn_span, ramp=ramp))
    out = fwd(params, query, key, value, key_pe)
    out = jax.block_until_ready(out)

    ref = reference_forward(raw_params, query, key, value,
                            num_heads=K, attn_span=attn_span, ramp=ramp)
    # bf16 MXU inputs / bf16 weights vs f32 default-precision reference.
    np.testing.assert_allclose(np.asarray(out), np.asarray(ref), rtol=3e-2, atol=3e-2)

    print("KERNEL_OK")
</pallas_src>

<mosaic_0001>
module attributes {stable_mosaic.version = 11 : i64} {
  func.func @_matmul_kernel(%arg0: i32, %arg1: i32, %arg2: i32, %arg3: memref<16x32xf32, #tpu.memory_space<vmem>>, %arg4: memref<32x32xbf16, #tpu.memory_space<vmem>>, %arg5: memref<16x32xbf16, #tpu.memory_space<vmem>>, %arg6: memref<16x32xf32, #tpu.memory_space<vmem>>) attributes {dimension_semantics = [#tpu.dimension_semantics<parallel>, #tpu.dimension_semantics<parallel>, #tpu.dimension_semantics<arbitrary>], iteration_bounds = array<i64: 1, 1, 1>, scalar_prefetch = 0 : i64, scratch_operands = 1 : i64, tpu.core_type = #tpu.core_type<tc>, window_params = [{transform_indices = @transform_0, window_bounds = array<i64: 16, 32>}, {transform_indices = @transform_1, window_bounds = array<i64: 32, 32>}, {transform_indices = @transform_2, window_bounds = array<i64: 16, 32>}]} {
    %c0_i32 = arith.constant 0 : i32
    %0 = arith.cmpi eq, %arg2, %c0_i32 : i32
    %1 = arith.extui %0 : i1 to i32
    %c0_i32_0 = arith.constant 0 : i32
    %2 = arith.cmpi ne, %1, %c0_i32_0 : i32
    scf.if %2 {
      %cst_10 = arith.constant 0.000000e+00 : f32
      %13 = vector.broadcast %cst_10 : f32 to vector<16x32xf32>
      %c0_11 = arith.constant 0 : index
      %c0_12 = arith.constant 0 : index
      %14 = vector.load %arg6[%c0_11, %c0_12] : memref<16x32xf32, #tpu.memory_space<vmem>>, vector<16x32xf32>
      tpu.vector_store %arg6[%c0_11, %c0_12], %13 {strides = array<i32>} : memref<16x32xf32, #tpu.memory_space<vmem>>, vector<16x32xf32>,
    } else {
    }
    %c0 = arith.constant 0 : index
    %c0_1 = arith.constant 0 : index
    %3 = vector.load %arg6[%c0, %c0_1] : memref<16x32xf32, #tpu.memory_space<vmem>>, vector<16x32xf32>
    %c0_2 = arith.constant 0 : index
    %c0_3 = arith.constant 0 : index
    %4 = vector.load %arg3[%c0_2, %c0_3] : memref<16x32xf32, #tpu.memory_space<vmem>>, vector<16x32xf32>
    %5 = arith.truncf %4 : vector<16x32xf32> to vector<16x32xbf16>
    %c0_4 = arith.constant 0 : index
    %c0_5 = arith.constant 0 : index
    %6 = vector.load %arg4[%c0_4, %c0_5] : memref<32x32xbf16, #tpu.memory_space<vmem>>, vector<32x32xbf16>
    %cst = arith.constant dense<0.000000e+00> : vector<16x32xf32>
    %7 = tpu.matmul %5, %6, %cst {dimension_numbers = #tpu.dot_dimension_numbers<[1], [0], [0], [1], [0, 0, 1, 1], [], []>} : vector<16x32xbf16>, vector<32x32xbf16>, vector<16x32xf32> -> vector<16x32xf32>
    %8 = arith.addf %3, %7 : vector<16x32xf32>
    %c0_6 = arith.constant 0 : index
    %c0_7 = arith.constant 0 : index
    %9 = vector.load %arg6[%c0_6, %c0_7] : memref<16x32xf32, #tpu.memory_space<vmem>>, vector<16x32xf32>
    tpu.vector_store %arg6[%c0_6, %c0_7], %8 {strides = array<i32>} : memref<16x32xf32, #tpu.memory_space<vmem>>, vector<16x32xf32>,
    %c0_i32_8 = arith.constant 0 : i32
    %10 = arith.cmpi eq, %arg2, %c0_i32_8 : i32
    %11 = arith.extui %10 : i1 to i32
    %c0_i32_9 = arith.constant 0 : i32
    %12 = arith.cmpi ne, %11, %c0_i32_9 : i32
    scf.if %12 {
      %c0_10 = arith.constant 0 : index
      %c0_11 = arith.constant 0 : index
      %13 = vector.load %arg6[%c0_10, %c0_11] : memref<16x32xf32, #tpu.memory_space<vmem>>, vector<16x32xf32>
      %14 = arith.truncf %13 : vector<16x32xf32> to vector<16x32xbf16>
      %c0_12 = arith.constant 0 : index
      %c0_13 = arith.constant 0 : index
      %15 = vector.load %arg5[%c0_12, %c0_13] : memref<16x32xbf16, #tpu.memory_space<vmem>>, vector<16x32xbf16>
      tpu.vector_store %arg5[%c0_12, %c0_13], %14 {strides = array<i32>} : memref<16x32xbf16, #tpu.memory_space<vmem>>, vector<16x32xbf16>,
    } else {
    }
    return
  }
  func.func @transform_0(%arg0: i32, %arg1: i32, %arg2: i32) -> (i32, i32) {
    %c0_i32 = arith.constant 0 : i32
    return %arg0, %arg2 : i32, i32
  }
  func.func @transform_1(%arg0: i32, %arg1: i32, %arg2: i32) -> (i32, i32) {
    %c0_i32 = arith.constant 0 : i32
    return %arg2, %arg1 : i32, i32
  }
  func.func @transform_2(%arg0: i32, %arg1: i32, %arg2: i32) -> (i32, i32) {
    %c0_i32 = arith.constant 0 : i32
    return %arg0, %arg1 : i32, i32
  }
}

module attributes {stable_mosaic.version = 11 : i64} {
  func.func @_matmul_kernel(%arg0: i32, %arg1: i32, %arg2: i32, %arg3: memref<32x32xf32, #tpu.memory_space<vmem>>, %arg4: memref<32x32xbf16, #tpu.memory_space<vmem>>, %arg5: memref<32x32xbf16, #tpu.memory_space<vmem>>, %arg6: memref<32x32xf32, #tpu.memory_space<vmem>>) attributes {dimension_semantics = [#tpu.dimension_semantics<parallel>, #tpu.dimension_semantics<parallel>, #tpu.dimension_semantics<arbitrary>], iteration_bounds = array<i64: 1, 1, 1>, scalar_prefetch = 0 : i64, scratch_operands = 1 : i64, tpu.core_type = #tpu.core_type<tc>, window_params = [{transform_indices = @transform_0, window_bounds = array<i64: 32, 32>}, {transform_indices = @transform_1, window_bounds = array<i64: 32, 32>}, {transform_indices = @transform_2, window_bounds = array<i64: 32, 32>}]} {
    %c0_i32 = arith.constant 0 : i32
    %0 = arith.cmpi eq, %arg2, %c0_i32 : i32
    %1 = arith.extui %0 : i1 to i32
    %c0_i32_0 = arith.constant 0 : i32
    %2 = arith.cmpi ne, %1, %c0_i32_0 : i32
    scf.if %2 {
      %cst_10 = arith.constant 0.000000e+00 : f32
      %13 = vector.broadcast %cst_10 : f32 to vector<32x32xf32>
      %c0_11 = arith.constant 0 : index
      %c0_12 = arith.constant 0 : index
      %14 = vector.load %arg6[%c0_11, %c0_12] : memref<32x32xf32, #tpu.memory_space<vmem>>, vector<32x32xf32>
      tpu.vector_store %arg6[%c0_11, %c0_12], %13 {strides = array<i32>} : memref<32x32xf32, #tpu.memory_space<vmem>>, vector<32x32xf32>,
    } else {
    }
    %c0 = arith.constant 0 : index
    %c0_1 = arith.constant 0 : index
    %3 = vector.load %arg6[%c0, %c0_1] : memref<32x32xf32, #tpu.memory_space<vmem>>, vector<32x32xf32>
    %c0_2 = arith.constant 0 : index
    %c0_3 = arith.constant 0 : index
    %4 = vector.load %arg3[%c0_2, %c0_3] : memref<32x32xf32, #tpu.memory_space<vmem>>, vector<32x32xf32>
    %5 = arith.truncf %4 : vector<32x32xf32> to vector<32x32xbf16>
    %c0_4 = arith.constant 0 : index
    %c0_5 = arith.constant 0 : index
    %6 = vector.load %arg4[%c0_4, %c0_5] : memref<32x32xbf16, #tpu.memory_space<vmem>>, vector<32x32xbf16>
    %cst = arith.constant dense<0.000000e+00> : vector<32x32xf32>
    %7 = tpu.matmul %5, %6, %cst {dimension_numbers = #tpu.dot_dimension_numbers<[1], [0], [0], [1], [0, 0, 1, 1], [], []>} : vector<32x32xbf16>, vector<32x32xbf16>, vector<32x32xf32> -> vector<32x32xf32>
    %8 = arith.addf %3, %7 : vector<32x32xf32>
    %c0_6 = arith.constant 0 : index
    %c0_7 = arith.constant 0 : index
    %9 = vector.load %arg6[%c0_6, %c0_7] : memref<32x32xf32, #tpu.memory_space<vmem>>, vector<32x32xf32>
    tpu.vector_store %arg6[%c0_6, %c0_7], %8 {strides = array<i32>} : memref<32x32xf32, #tpu.memory_space<vmem>>, vector<32x32xf32>,
    %c0_i32_8 = arith.constant 0 : i32
    %10 = arith.cmpi eq, %arg2, %c0_i32_8 : i32
    %11 = arith.extui %10 : i1 to i32
    %c0_i32_9 = arith.constant 0 : i32
    %12 = arith.cmpi ne, %11, %c0_i32_9 : i32
    scf.if %12 {
      %c0_10 = arith.constant 0 : index
      %c0_11 = arith.constant 0 : index
      %13 = vector.load %arg6[%c0_10, %c0_11] : memref<32x32xf32, #tpu.memory_space<vmem>>, vector<32x32xf32>
      %14 = arith.truncf %13 : vector<32x32xf32> to vector<32x32xbf16>
      %c0_12 = arith.constant 0 : index
      %c0_13 = arith.constant 0 : index
      %15 = vector.load %arg5[%c0_12, %c0_13] : memref<32x32xbf16, #tpu.memory_space<vmem>>, vector<32x32xbf16>
      tpu.vector_store %arg5[%c0_12, %c0_13], %14 {strides = array<i32>} : memref<32x32xbf16, #tpu.memory_space<vmem>>, vector<32x32xbf16>,
    } else {
    }
    return
  }
  func.func @transform_0(%arg0: i32, %arg1: i32, %arg2: i32) -> (i32, i32) {
    %c0_i32 = arith.constant 0 : i32
    return %arg0, %arg2 : i32, i32
  }
  func.func @transform_1(%arg0: i32, %arg1: i32, %arg2: i32) -> (i32, i32) {
    %c0_i32 = arith.constant 0 : i32
    return %arg2, %arg1 : i32, i32
  }
  func.func @transform_2(%arg0: i32, %arg1: i32, %arg2: i32) -> (i32, i32) {
    %c0_i32 = arith.constant 0 : i32
    return %arg0, %arg1 : i32, i32
  }
}

module attributes {stable_mosaic.version = 11 : i64} {
  func.func @_attn_out_kernel(%arg0: i32, %arg1: i32, %arg2: i32, %arg3: memref<1x8x32xbf16, #tpu.memory_space<vmem>>, %arg4: memref<1x16x32xbf16, #tpu.memory_space<vmem>>, %arg5: memref<1x16x32xbf16, #tpu.memory_space<vmem>>, %arg6: memref<4x1x16xf32, #tpu.memory_space<vmem>>, %arg7: memref<32x32xbf16, #tpu.memory_space<vmem>>, %arg8: memref<1x8x32xf32, #tpu.memory_space<vmem>>, %arg9: memref<4x8x1xf32, #tpu.memory_space<vmem>>, %arg10: memref<4x8x1xf32, #tpu.memory_space<vmem>>, %arg11: memref<8x32xf32, #tpu.memory_space<vmem>>) attributes {dimension_semantics = [#tpu.dimension_semantics<parallel>, #tpu.dimension_semantics<parallel>, #tpu.dimension_semantics<arbitrary>], iteration_bounds = array<i64: 2, 1, 1>, scalar_prefetch = 0 : i64, scratch_operands = 3 : i64, tpu.core_type = #tpu.core_type<tc>, window_params = [{transform_indices = @transform_0, window_bounds = array<i64: 1, 8, 32>}, {transform_indices = @transform_1, window_bounds = array<i64: 1, 16, 32>}, {transform_indices = @transform_2, window_bounds = array<i64: 1, 16, 32>}, {transform_indices = @transform_3, window_bounds = array<i64: 4, 1, 16>}, {pipeline_mode = #tpu.pipeline_mode<synchronous>, transform_indices = @transform_4, window_bounds = array<i64: 32, 32>}, {transform_indices = @transform_5, window_bounds = array<i64: 1, 8, 32>}]} {
    %c0_i32 = arith.constant 0 : i32
    %0 = arith.cmpi eq, %arg2, %c0_i32 : i32
    %1 = arith.extui %0 : i1 to i32
    %c0_i32_0 = arith.constant 0 : i32
    %2 = arith.cmpi ne, %1, %c0_i32_0 : i32
    scf.if %2 {
      %cst_123 = arith.constant 0xFF800000 : f32
      %166 = vector.broadcast %cst_123 : f32 to vector<4x8x1xf32>
      %c0_124 = arith.constant 0 : index
      %c0_125 = arith.constant 0 : index
      %c0_126 = arith.constant 0 : index
      %167 = vector.load %arg9[%c0_124, %c0_125, %c0_126] : memref<4x8x1xf32, #tpu.memory_space<vmem>>, vector<4x8x1xf32>
      tpu.vector_store %arg9[%c0_124, %c0_125, %c0_126], %166 {strides = array<i32>} : memref<4x8x1xf32, #tpu.memory_space<vmem>>, vector<4x8x1xf32>,
      %cst_127 = arith.constant 0.000000e+00 : f32
      %168 = vector.broadcast %cst_127 : f32 to vector<4x8x1xf32>
      %c0_128 = arith.constant 0 : index
      %c0_129 = arith.constant 0 : index
      %c0_130 = arith.constant 0 : index
      %169 = vector.load %arg10[%c0_128, %c0_129, %c0_130] : memref<4x8x1xf32, #tpu.memory_space<vmem>>, vector<4x8x1xf32>
      tpu.vector_store %arg10[%c0_128, %c0_129, %c0_130], %168 {strides = array<i32>} : memref<4x8x1xf32, #tpu.memory_space<vmem>>, vector<4x8x1xf32>,
      %cst_131 = arith.constant 0.000000e+00 : f32
      %170 = vector.broadcast %cst_131 : f32 to vector<8x32xf32>
      %c0_132 = arith.constant 0 : index
      %c0_133 = arith.constant 0 : index
      %171 = vector.load %arg11[%c0_132, %c0_133] : memref<8x32xf32, #tpu.memory_space<vmem>>, vector<8x32xf32>
      tpu.vector_store %arg11[%c0_132, %c0_133], %170 {strides = array<i32>} : memref<8x32xf32, #tpu.memory_space<vmem>>, vector<8x32xf32>,
    } else {
    }
    %c0 = arith.constant 0 : index
    %c0_1 = arith.constant 0 : index
    %c0_2 = arith.constant 0 : index
    %3 = vector.load %arg3[%c0, %c0_1, %c0_2] : memref<1x8x32xbf16, #tpu.memory_space<vmem>>, vector<1x8x8xbf16>
    %4 = vector.shape_cast %3 : vector<1x8x8xbf16> to vector<8x8xbf16>
    %c0_3 = arith.constant 0 : index
    %c0_4 = arith.constant 0 : index
    %c0_5 = arith.constant 0 : index
    %5 = vector.load %arg4[%c0_3, %c0_4, %c0_5] : memref<1x16x32xbf16, #tpu.memory_space<vmem>>, vector<1x16x8xbf16>
    %6 = vector.shape_cast %5 : vector<1x16x8xbf16> to vector<16x8xbf16>
    %cst = arith.constant dense<0.000000e+00> : vector<8x16xf32>
    %7 = tpu.matmul %4, %6, %cst {dimension_numbers = #tpu.dot_dimension_numbers<[1], [1], [0], [0], [0, 0, 1, 0], [], []>} : vector<8x8xbf16>, vector<16x8xbf16>, vector<8x16xf32> -> vector<8x16xf32>
    %c0_6 = arith.constant 0 : index
    %c0_7 = arith.constant 0 : index
    %c0_8 = arith.constant 0 : index
    %8 = vector.load %arg9[%c0_6, %c0_7, %c0_8] : memref<4x8x1xf32, #tpu.memory_space<vmem>>, vector<1x8x1xf32>
    %9 = vector.shape_cast %8 : vector<1x8x1xf32> to vector<8x1xf32>
    %cst_9 = arith.constant dense<0xFF800000> : vector<8xf32>
    %10 = vector.multi_reduction <maximumf>, %7, %cst_9 [1] : vector<8x16xf32> to vector<8xf32>
    %11 = vector.shape_cast %10 : vector<8xf32> to vector<8x1xf32>
    %12 = arith.maximumf %9, %11 : vector<8x1xf32>
    %13 = arith.subf %9, %12 : vector<8x1xf32>
    %14 = math.exp %13 : vector<8x1xf32>
    %15 = vector.broadcast %12 : vector<8x1xf32> to vector<8x16xf32>
    %16 = arith.subf %7, %15 : vector<8x16xf32>
    %17 = math.exp %16 : vector<8x16xf32>
    %c0_10 = arith.constant 0 : index
    %c0_11 = arith.constant 0 : index
    %c0_12 = arith.constant 0 : index
    %18 = vector.load %arg10[%c0_10, %c0_11, %c0_12] : memref<4x8x1xf32, #tpu.memory_space<vmem>>, vector<1x8x1xf32>
    %19 = vector.shape_cast %18 : vector<1x8x1xf32> to vector<8x1xf32>
    %20 = arith.mulf %14, %19 : vector<8x1xf32>
    %cst_13 = arith.constant dense<0.000000e+00> : vector<8xf32>
    %21 = vector.multi_reduction <add>, %17, %cst_13 [1] : vector<8x16xf32> to vector<8xf32>
    %22 = vector.shape_cast %21 : vector<8xf32> to vector<8x1xf32>
    %23 = arith.addf %20, %22 : vector<8x1xf32>
    %c0_14 = arith.constant 0 : index
    %c0_15 = arith.constant 0 : index
    %c0_16 = arith.constant 0 : index
    %24 = vector.load %arg10[%c0_14, %c0_15, %c0_16] : memref<4x8x1xf32, #tpu.memory_space<vmem>>, vector<1x8x1xf32>
    %25 = vector.shape_cast %24 : vector<1x8x1xf32> to vector<8x1xf32>
    %26 = vector.shape_cast %23 : vector<8x1xf32> to vector<1x8x1xf32>
    tpu.vector_store %arg10[%c0_14, %c0_15, %c0_16], %26 {strides = array<i32>} : memref<4x8x1xf32, #tpu.memory_space<vmem>>, vector<1x8x1xf32>,
    %c0_17 = arith.constant 0 : index
    %c0_18 = arith.constant 0 : index
    %c0_19 = arith.constant 0 : index
    %27 = vector.load %arg6[%c0_17, %c0_18, %c0_19] : memref<4x1x16xf32, #tpu.memory_space<vmem>>, vector<1x1x16xf32>
    %28 = vector.shape_cast %27 : vector<1x1x16xf32> to vector<1x16xf32>
    %29 = vector.broadcast %28 : vector<1x16xf32> to vector<8x16xf32>
    %30 = arith.mulf %17, %29 : vector<8x16xf32>
    %31 = arith.truncf %30 : vector<8x16xf32> to vector<8x16xbf16>
    %c0_20 = arith.constant 0 : index
    %c0_21 = arith.constant 0 : index
    %32 = vector.load %arg11[%c0_20, %c0_21] : memref<8x32xf32, #tpu.memory_space<vmem>>, vector<8x8xf32>
    %33 = vector.broadcast %14 : vector<8x1xf32> to vector<8x8xf32>
    %34 = arith.mulf %33, %32 : vector<8x8xf32>
    %c0_22 = arith.constant 0 : index
    %c0_23 = arith.constant 0 : index
    %c0_24 = arith.constant 0 : index
    %35 = vector.load %arg5[%c0_22, %c0_23, %c0_24] : memref<1x16x32xbf16, #tpu.memory_space<vmem>>, vector<1x16x8xbf16>
    %36 = vector.shape_cast %35 : vector<1x16x8xbf16> to vector<16x8xbf16>
    %cst_25 = arith.constant dense<0.000000e+00> : vector<8x8xf32>
    %37 = tpu.matmul %31, %36, %cst_25 {dimension_numbers = #tpu.dot_dimension_numbers<[1], [0], [0], [1], [0, 0, 1, 1], [], []>} : vector<8x16xbf16>, vector<16x8xbf16>, vector<8x8xf32> -> vector<8x8xf32>
    %38 = arith.addf %34, %37 : vector<8x8xf32>
    %c0_26 = arith.constant 0 : index
    %c0_27 = arith.constant 0 : index
    %39 = vector.load %arg11[%c0_26, %c0_27] : memref<8x32xf32, #tpu.memory_space<vmem>>, vector<8x8xf32>
    tpu.vector_store %arg11[%c0_26, %c0_27], %38 {strides = array<i32>} : memref<8x32xf32, #tpu.memory_space<vmem>>, vector<8x8xf32>,
    %c0_28 = arith.constant 0 : index
    %c0_29 = arith.constant 0 : index
    %c0_30 = arith.constant 0 : index
    %40 = vector.load %arg9[%c0_28, %c0_29, %c0_30] : memref<4x8x1xf32, #tpu.memory_space<vmem>>, vector<1x8x1xf32>
    %41 = vector.shape_cast %40 : vector<1x8x1xf32> to vector<8x1xf32>
    %42 = vector.shape_cast %12 : vector<8x1xf32> to vector<1x8x1xf32>
    tpu.vector_store %arg9[%c0_28, %c0_29, %c0_30], %42 {strides = array<i32>} : memref<4x8x1xf32, #tpu.memory_space<vmem>>, vector<1x8x1xf32>,
    %c0_31 = arith.constant 0 : index
    %c0_32 = arith.constant 0 : index
    %c8 = arith.constant 8 : index
    %43 = vector.load %arg3[%c0_31, %c0_32, %c8] : memref<1x8x32xbf16, #tpu.memory_space<vmem>>, vector<1x8x8xbf16>
    %44 = vector.shape_cast %43 : vector<1x8x8xbf16> to vector<8x8xbf16>
    %c0_33 = arith.constant 0 : index
    %c0_34 = arith.constant 0 : index
    %c8_35 = arith.constant 8 : index
    %45 = vector.load %arg4[%c0_33, %c0_34, %c8_35] : memref<1x16x32xbf16, #tpu.memory_space<vmem>>, vector<1x16x8xbf16>
    %46 = vector.shape_cast %45 : vector<1x16x8xbf16> to vector<16x8xbf16>
    %cst_36 = arith.constant dense<0.000000e+00> : vector<8x16xf32>
    %47 = tpu.matmul %44, %46, %cst_36 {dimension_numbers = #tpu.dot_dimension_numbers<[1], [1], [0], [0], [0, 0, 1, 0], [], []>} : vector<8x8xbf16>, vector<16x8xbf16>, vector<8x16xf32> -> vector<8x16xf32>
    %c1 = arith.constant 1 : index
    %c0_37 = arith.constant 0 : index
    %c0_38 = arith.constant 0 : index
    %48 = vector.load %arg9[%c1, %c0_37, %c0_38] : memref<4x8x1xf32, #tpu.memory_space<vmem>>, vector<1x8x1xf32>
    %49 = vector.shape_cast %48 : vector<1x8x1xf32> to vector<8x1xf32>
    %cst_39 = arith.constant dense<0xFF800000> : vector<8xf32>
    %50 = vector.multi_reduction <maximumf>, %47, %cst_39 [1] : vector<8x16xf32> to vector<8xf32>
    %51 = vector.shape_cast %50 : vector<8xf32> to vector<8x1xf32>
    %52 = arith.maximumf %49, %51 : vector<8x1xf32>
    %53 = arith.subf %49, %52 : vector<8x1xf32>
    %54 = math.exp %53 : vector<8x1xf32>
    %55 = vector.broadcast %52 : vector<8x1xf32> to vector<8x16xf32>
    %56 = arith.subf %47, %55 : vector<8x16xf32>
    %57 = math.exp %56 : vector<8x16xf32>
    %c1_40 = arith.constant 1 : index
    %c0_41 = arith.constant 0 : index
    %c0_42 = arith.constant 0 : index
    %58 = vector.load %arg10[%c1_40, %c0_41, %c0_42] : memref<4x8x1xf32, #tpu.memory_space<vmem>>, vector<1x8x1xf32>
    %59 = vector.shape_cast %58 : vector<1x8x1xf32> to vector<8x1xf32>
    %60 = arith.mulf %54, %59 : vector<8x1xf32>
    %cst_43 = arith.constant dense<0.000000e+00> : vector<8xf32>
    %61 = vector.multi_reduction <add>, %57, %cst_43 [1] : vector<8x16xf32> to vector<8xf32>
    %62 = vector.shape_cast %61 : vector<8xf32> to vector<8x1xf32>
    %63 = arith.addf %60, %62 : vector<8x1xf32>
    %c1_44 = arith.constant 1 : index
    %c0_45 = arith.constant 0 : index
    %c0_46 = arith.constant 0 : index
    %64 = vector.load %arg10[%c1_44, %c0_45, %c0_46] : memref<4x8x1xf32, #tpu.memory_space<vmem>>, vector<1x8x1xf32>
    %65 = vector.shape_cast %64 : vector<1x8x1xf32> to vector<8x1xf32>
    %66 = vector.shape_cast %63 : vector<8x1xf32> to vector<1x8x1xf32>
    tpu.vector_store %arg10[%c1_44, %c0_45, %c0_46], %66 {strides = array<i32>} : memref<4x8x1xf32, #tpu.memory_space<vmem>>, vector<1x8x1xf32>,
    %c1_47 = arith.constant 1 : index
    %c0_48 = arith.constant 0 : index
    %c0_49 = arith.constant 0 : index
    %67 = vector.load %arg6[%c1_47, %c0_48, %c0_49] : memref<4x1x16xf32, #tpu.memory_space<vmem>>, vector<1x1x16xf32>
    %68 = vector.shape_cast %67 : vector<1x1x16xf32> to vector<1x16xf32>
    %69 = vector.broadcast %68 : vector<1x16xf32> to vector<8x16xf32>
    %70 = arith.mulf %57, %69 : vector<8x16xf32>
    %71 = arith.truncf %70 : vector<8x16xf32> to vector<8x16xbf16>
    %c0_50 = arith.constant 0 : index
    %c8_51 = arith.constant 8 : index
    %72 = vector.load %arg11[%c0_50, %c8_51] : memref<8x32xf32, #tpu.memory_space<vmem>>, vector<8x8xf32>
    %73 = vector.broadcast %54 : vector<8x1xf32> to vector<8x8xf32>
    %74 = arith.mulf %73, %72 : vector<8x8xf32>
    %c0_52 = arith.constant 0 : index
    %c0_53 = arith.constant 0 : index
    %c8_54 = arith.constant 8 : index
    %75 = vector.load %arg5[%c0_52, %c0_53, %c8_54] : memref<1x16x32xbf16, #tpu.memory_space<vmem>>, vector<1x16x8xbf16>
    %76 = vector.shape_cast %75 : vector<1x16x8xbf16> to vector<16x8xbf16>
    %cst_55 = arith.constant dense<0.000000e+00> : vector<8x8xf32>
    %77 = tpu.matmul %71, %76, %cst_55 {dimension_numbers = #tpu.dot_dimension_numbers<[1], [0], [0], [1], [0, 0, 1, 1], [], []>} : vector<8x16xbf16>, vector<16x8xbf16>, vector<8x8xf32> -> vector<8x8xf32>
    %78 = arith.addf %74, %77 : vector<8x8xf32>
    %c0_56 = arith.constant 0 : index
    %c8_57 = arith.constant 8 : index
    %79 = vector.load %arg11[%c0_56, %c8_57] : memref<8x32xf32, #tpu.memory_space<vmem>>, vector<8x8xf32>
    tpu.vector_store %arg11[%c0_56, %c8_57], %78 {strides = array<i32>} : memref<8x32xf32, #tpu.memory_space<vmem>>, vector<8x8xf32>,
    %c1_58 = arith.constant 1 : index
    %c0_59 = arith.constant 0 : index
    %c0_60 = arith.constant 0 : index
    %80 = vector.load %arg9[%c1_58, %c0_59, %c0_60] : memref<4x8x1xf32, #tpu.memory_space<vmem>>, vector<1x8x1xf32>
    %81 = vector.shape_cast %80 : vector<1x8x1xf32> to vector<8x1xf32>
    %82 = vector.shape_cast %52 : vector<8x1xf32> to vector<1x8x1xf32>
    tpu.vector_store %arg9[%c1_58, %c0_59, %c0_60], %82 {strides = array<i32>} : memref<4x8x1xf32, #tpu.memory_space<vmem>>, vector<1x8x1xf32>,
    %c0_61 = arith.constant 0 : index
    %c0_62 = arith.constant 0 : index
    %c16 = arith.constant 16 : index
    %83 = vector.load %arg3[%c0_61, %c0_62, %c16] : memref<1x8x32xbf16, #tpu.memory_space<vmem>>, vector<1x8x8xbf16>
    %84 = vector.shape_cast %83 : vector<1x8x8xbf16> to vector<8x8xbf16>
    %c0_63 = arith.constant 0 : index
    %c0_64 = arith.constant 0 : index
    %c16_65 = arith.constant 16 : index
    %85 = vector.load %arg4[%c0_63, %c0_64, %c16_65] : memref<1x16x32xbf16, #tpu.memory_space<vmem>>, vector<1x16x8xbf16>
    %86 = vector.shape_cast %85 : vector<1x16x8xbf16> to vector<16x8xbf16>
    %cst_66 = arith.constant dense<0.000000e+00> : vector<8x16xf32>
    %87 = tpu.matmul %84, %86, %cst_66 {dimension_numbers = #tpu.dot_dimension_numbers<[1], [1], [0], [0], [0, 0, 1, 0], [], []>} : vector<8x8xbf16>, vector<16x8xbf16>, vector<8x16xf32> -> vector<8x16xf32>
    %c2 = arith.constant 2 : index
    %c0_67 = arith.constant 0 : index
    %c0_68 = arith.constant 0 : index
    %88 = vector.load %arg9[%c2, %c0_67, %c0_68] : memref<4x8x1xf32, #tpu.memory_space<vmem>>, vector<1x8x1xf32>
    %89 = vector.shape_cast %88 : vector<1x8x1xf32> to vector<8x1xf32>
    %cst_69 = arith.constant dense<0xFF800000> : vector<8xf32>
    %90 = vector.multi_reduction <maximumf>, %87, %cst_69 [1] : vector<8x16xf32> to vector<8xf32>
    %91 = vector.shape_cast %90 : vector<8xf32> to vector<8x1xf32>
    %92 = arith.maximumf %89, %91 : vector<8x1xf32>
    %93 = arith.subf %89, %92 : vector<8x1xf32>
    %94 = math.exp %93 : vector<8x1xf32>
    %95 = vector.broadcast %92 : vector<8x1xf32> to vector<8x16xf32>
    %96 = arith.subf %87, %95 : vector<8x16xf32>
    %97 = math.exp %96 : vector<8x16xf32>
    %c2_70 = arith.constant 2 : index
    %c0_71 = arith.constant 0 : index
    %c0_72 = arith.constant 0 : index
    %98 = vector.load %arg10[%c2_70, %c0_71, %c0_72] : memref<4x8x1xf32, #tpu.memory_space<vmem>>, vector<1x8x1xf32>
    %99 = vector.shape_cast %98 : vector<1x8x1xf32> to vector<8x1xf32>
    %100 = arith.mulf %94, %99 : vector<8x1xf32>
    %cst_73 = arith.constant dense<0.000000e+00> : vector<8xf32>
    %101 = vector.multi_reduction <add>, %97, %cst_73 [1] : vector<8x16xf32> to vector<8xf32>
    %102 = vector.shape_cast %101 : vector<8xf32> to vector<8x1xf32>
    %103 = arith.addf %100, %102 : vector<8x1xf32>
    %c2_74 = arith.constant 2 : index
    %c0_75 = arith.constant 0 : index
    %c0_76 = arith.constant 0 : index
    %104 = vector.load %arg10[%c2_74, %c0_75, %c0_76] : memref<4x8x1xf32, #tpu.memory_space<vmem>>, vector<1x8x1xf32>
    %105 = vector.shape_cast %104 : vector<1x8x1xf32> to vector<8x1xf32>
    %106 = vector.shape_cast %103 : vector<8x1xf32> to vector<1x8x1xf32>
    tpu.vector_store %arg10[%c2_74, %c0_75, %c0_76], %106 {strides = array<i32>} : memref<4x8x1xf32, #tpu.memory_space<vmem>>, vector<1x8x1xf32>,
    %c2_77 = arith.constant 2 : index
    %c0_78 = arith.constant 0 : index
    %c0_79 = arith.constant 0 : index
    %107 = vector.load %arg6[%c2_77, %c0_78, %c0_79] : memref<4x1x16xf32, #tpu.memory_space<vmem>>, vector<1x1x16xf32>
    %108 = vector.shape_cast %107 : vector<1x1x16xf32> to vector<1x16xf32>
    %109 = vector.broadcast %108 : vector<1x16xf32> to vector<8x16xf32>
    %110 = arith.mulf %97, %109 : vector<8x16xf32>
    %111 = arith.truncf %110 : vector<8x16xf32> to vector<8x16xbf16>
    %c0_80 = arith.constant 0 : index
    %c16_81 = arith.constant 16 : index
    %112 = vector.load %arg11[%c0_80, %c16_81] : memref<8x32xf32, #tpu.memory_space<vmem>>, vector<8x8xf32>
    %113 = vector.broadcast %94 : vector<8x1xf32> to vector<8x8xf32>
    %114 = arith.mulf %113, %112 : vector<8x8xf32>
    %c0_82 = arith.constant 0 : index
    %c0_83 = arith.constant 0 : index
    %c16_84 = arith.constant 16 : index
    %115 = vector.load %arg5[%c0_82, %c0_83, %c16_84] : memref<1x16x32xbf16, #tpu.memory_space<vmem>>, vector<1x16x8xbf16>
    %116 = vector.shape_cast %115 : vector<1x16x8xbf16> to vector<16x8xbf16>
    %cst_85 = arith.constant dense<0.000000e+00> : vector<8x8xf32>
    %117 = tpu.matmul %111, %116, %cst_85 {dimension_numbers = #tpu.dot_dimension_numbers<[1], [0], [0], [1], [0, 0, 1, 1], [], []>} : vector<8x16xbf16>, vector<16x8xbf16>, vector<8x8xf32> -> vector<8x8xf32>
    %118 = arith.addf %114, %117 : vector<8x8xf32>
    %c0_86 = arith.constant 0 : index
    %c16_87 = arith.constant 16 : index
    %119 = vector.load %arg11[%c0_86, %c16_87] : memref<8x32xf32, #tpu.memory_space<vmem>>, vector<8x8xf32>
    tpu.vector_store %arg11[%c0_86, %c16_87], %118 {strides = array<i32>} : memref<8x32xf32, #tpu.memory_space<vmem>>, vector<8x8xf32>,
    %c2_88 = arith.constant 2 : index
    %c0_89 = arith.constant 0 : index
    %c0_90 = arith.constant 0 : index
    %120 = vector.load %arg9[%c2_88, %c0_89, %c0_90] : memref<4x8x1xf32, #tpu.memory_space<vmem>>, vector<1x8x1xf32>
    %121 = vector.shape_cast %120 : vector<1x8x1xf32> to vector<8x1xf32>
    %122 = vector.shape_cast %92 : vector<8x1xf32> to vector<1x8x1xf32>
    tpu.vector_store %arg9[%c2_88, %c0_89, %c0_90], %122 {strides = array<i32>} : memref<4x8x1xf32, #tpu.memory_space<vmem>>, vector<1x8x1xf32>,
    %c0_91 = arith.constant 0 : index
    %c0_92 = arith.constant 0 : index
    %c24 = arith.constant 24 : index
    %123 = vector.load %arg3[%c0_91, %c0_92, %c24] : memref<1x8x32xbf16, #tpu.memory_space<vmem>>, vector<1x8x8xbf16>
    %124 = vector.shape_cast %123 : vector<1x8x8xbf16> to vector<8x8xbf16>
    %c0_93 = arith.constant 0 : index
    %c0_94 = arith.constant 0 : index
    %c24_95 = arith.constant 24 : index
    %125 = vector.load %arg4[%c0_93, %c0_94, %c24_95] : memref<1x16x32xbf16, #tpu.memory_space<vmem>>, vector<1x16x8xbf16>
    %126 = vector.shape_cast %125 : vector<1x16x8xbf16> to vector<16x8xbf16>
    %cst_96 = arith.constant dense<0.000000e+00> : vector<8x16xf32>
    %127 = tpu.matmul %124, %126, %cst_96 {dimension_numbers = #tpu.dot_dimension_numbers<[1], [1], [0], [0], [0, 0, 1, 0], [], []>} : vector<8x8xbf16>, vector<16x8xbf16>, vector<8x16xf32> -> vector<8x16xf32>
    %c3 = arith.constant 3 : index
    %c0_97 = arith.constant 0 : index
    %c0_98 = arith.constant 0 : index
    %128 = vector.load %arg9[%c3, %c0_97, %c0_98] : memref<4x8x1xf32, #tpu.memory_space<vmem>>, vector<1x8x1xf32>
    %129 = vector.shape_cast %128 : vector<1x8x1xf32> to vector<8x1xf32>
    %cst_99 = arith.constant dense<0xFF800000> : vector<8xf32>
    %130 = vector.multi_reduction <maximumf>, %127, %cst_99 [1] : vector<8x16xf32> to vector<8xf32>
    %131 = vector.shape_cast %130 : vector<8xf32> to vector<8x1xf32>
    %132 = arith.maximumf %129, %131 : vector<8x1xf32>
    %133 = arith.subf %129, %132 : vector<8x1xf32>
    %134 = math.exp %133 : vector<8x1xf32>
    %135 = vector.broadcast %132 : vector<8x1xf32> to vector<8x16xf32>
    %136 = arith.subf %127, %135 : vector<8x16xf32>
    %137 = math.exp %136 : vector<8x16xf32>
    %c3_100 = arith.constant 3 : index
    %c0_101 = arith.constant 0 : index
    %c0_102 = arith.constant 0 : index
    %138 = vector.load %arg10[%c3_100, %c0_101, %c0_102] : memref<4x8x1xf32, #tpu.memory_space<vmem>>, vector<1x8x1xf32>
    %139 = vector.shape_cast %138 : vector<1x8x1xf32> to vector<8x1xf32>
    %140 = arith.mulf %134, %139 : vector<8x1xf32>
    %cst_103 = arith.constant dense<0.000000e+00> : vector<8xf32>
    %141 = vector.multi_reduction <add>, %137, %cst_103 [1] : vector<8x16xf32> to vector<8xf32>
    %142 = vector.shape_cast %141 : vector<8xf32> to vector<8x1xf32>
    %143 = arith.addf %140, %142 : vector<8x1xf32>
    %c3_104 = arith.constant 3 : index
    %c0_105 = arith.constant 0 : index
    %c0_106 = arith.constant 0 : index
    %144 = vector.load %arg10[%c3_104, %c0_105, %c0_106] : memref<4x8x1xf32, #tpu.memory_space<vmem>>, vector<1x8x1xf32>
    %145 = vector.shape_cast %144 : vector<1x8x1xf32> to vector<8x1xf32>
    %146 = vector.shape_cast %143 : vector<8x1xf32> to vector<1x8x1xf32>
    tpu.vector_store %arg10[%c3_104, %c0_105, %c0_106], %146 {strides = array<i32>} : memref<4x8x1xf32, #tpu.memory_space<vmem>>, vector<1x8x1xf32>,
    %c3_107 = arith.constant 3 : index
    %c0_108 = arith.constant 0 : index
    %c0_109 = arith.constant 0 : index
    %147 = vector.load %arg6[%c3_107, %c0_108, %c0_109] : memref<4x1x16xf32, #tpu.memory_space<vmem>>, vector<1x1x16xf32>
    %148 = vector.shape_cast %147 : vector<1x1x16xf32> to vector<1x16xf32>
    %149 = vector.broadcast %148 : vector<1x16xf32> to vector<8x16xf32>
    %150 = arith.mulf %137, %149 : vector<8x16xf32>
    %151 = arith.truncf %150 : vector<8x16xf32> to vector<8x16xbf16>
    %c0_110 = arith.constant 0 : index
    %c24_111 = arith.constant 24 : index
    %152 = vector.load %arg11[%c0_110, %c24_111] : memref<8x32xf32, #tpu.memory_space<vmem>>, vector<8x8xf32>
    %153 = vector.broadcast %134 : vector<8x1xf32> to vector<8x8xf32>
    %154 = arith.mulf %153, %152 : vector<8x8xf32>
    %c0_112 = arith.constant 0 : index
    %c0_113 = arith.constant 0 : index
    %c24_114 = arith.constant 24 : index
    %155 = vector.load %arg5[%c0_112, %c0_113, %c24_114] : memref<1x16x32xbf16, #tpu.memory_space<vmem>>, vector<1x16x8xbf16>
    %156 = vector.shape_cast %155 : vector<1x16x8xbf16> to vector<16x8xbf16>
    %cst_115 = arith.constant dense<0.000000e+00> : vector<8x8xf32>
    %157 = tpu.matmul %151, %156, %cst_115 {dimension_numbers = #tpu.dot_dimension_numbers<[1], [0], [0], [1], [0, 0, 1, 1], [], []>} : vector<8x16xbf16>, vector<16x8xbf16>, vector<8x8xf32> -> vector<8x8xf32>
    %158 = arith.addf %154, %157 : vector<8x8xf32>
    %c0_116 = arith.constant 0 : index
    %c24_117 = arith.constant 24 : index
    %159 = vector.load %arg11[%c0_116, %c24_117] : memref<8x32xf32, #tpu.memory_space<vmem>>, vector<8x8xf32>
    tpu.vector_store %arg11[%c0_116, %c24_117], %158 {strides = array<i32>} : memref<8x32xf32, #tpu.memory_space<vmem>>, vector<8x8xf32>,
    %c3_118 = arith.constant 3 : index
    %c0_119 = arith.constant 0 : index
    %c0_120 = arith.constant 0 : index
    %160 = vector.load %arg9[%c3_118, %c0_119, %c0_120] : memref<4x8x1xf32, #tpu.memory_space<vmem>>, vector<1x8x1xf32>
    %161 = vector.shape_cast %160 : vector<1x8x1xf32> to vector<8x1xf32>
    %162 = vector.shape_cast %132 : vector<8x1xf32> to vector<1x8x1xf32>
    tpu.vector_store %arg9[%c3_118, %c0_119, %c0_120], %162 {strides = array<i32>} : memref<4x8x1xf32, #tpu.memory_space<vmem>>, vector<1x8x1xf32>,
    %c0_i32_121 = arith.constant 0 : i32
    %163 = arith.cmpi eq, %arg2, %c0_i32_121 : i32
    %164 = arith.extui %163 : i1 to i32
    %c0_i32_122 = arith.constant 0 : i32
    %165 = arith.cmpi ne, %164, %c0_i32_122 : i32
    scf.if %165 {
      %c0_123 = arith.constant 0 : index
      %c0_124 = arith.constant 0 : index
      %166 = vector.load %arg11[%c0_123, %c0_124] : memref<8x32xf32, #tpu.memory_space<vmem>>, vector<8x8xf32>
      %c0_125 = arith.constant 0 : index
      %c0_126 = arith.constant 0 : index
      %c0_127 = arith.constant 0 : index
      %167 = vector.load %arg10[%c0_125, %c0_126, %c0_127] : memref<4x8x1xf32, #tpu.memory_space<vmem>>, vector<1x8x1xf32>
      %168 = vector.shape_cast %167 : vector<1x8x1xf32> to vector<8x1xf32>
      %169 = vector.broadcast %168 : vector<8x1xf32> to vector<8x8xf32>
      %170 = arith.divf %166, %169 : vector<8x8xf32>
      %c0_128 = arith.constant 0 : index
      %c0_129 = arith.constant 0 : index
      %171 = vector.load %arg11[%c0_128, %c0_129] : memref<8x32xf32, #tpu.memory_space<vmem>>, vector<8x8xf32>
      tpu.vector_store %arg11[%c0_128, %c0_129], %170 {strides = array<i32>} : memref<8x32xf32, #tpu.memory_space<vmem>>, vector<8x8xf32>,
      %c0_130 = arith.constant 0 : index
      %c8_131 = arith.constant 8 : index
      %172 = vector.load %arg11[%c0_130, %c8_131] : memref<8x32xf32, #tpu.memory_space<vmem>>, vector<8x8xf32>
      %c1_132 = arith.constant 1 : index
      %c0_133 = arith.constant 0 : index
      %c0_134 = arith.constant 0 : index
      %173 = vector.load %arg10[%c1_132, %c0_133, %c0_134] : memref<4x8x1xf32, #tpu.memory_space<vmem>>, vector<1x8x1xf32>
      %174 = vector.shape_cast %173 : vector<1x8x1xf32> to vector<8x1xf32>
      %175 = vector.broadcast %174 : vector<8x1xf32> to vector<8x8xf32>
      %176 = arith.divf %172, %175 : vector<8x8xf32>
      %c0_135 = arith.constant 0 : index
      %c8_136 = arith.constant 8 : index
      %177 = vector.load %arg11[%c0_135, %c8_136] : memref<8x32xf32, #tpu.memory_space<vmem>>, vector<8x8xf32>
      tpu.vector_store %arg11[%c0_135, %c8_136], %176 {strides = array<i32>} : memref<8x32xf32, #tpu.memory_space<vmem>>, vector<8x8xf32>,
      %c0_137 = arith.constant 0 : index
      %c16_138 = arith.constant 16 : index
      %178 = vector.load %arg11[%c0_137, %c16_138] : memref<8x32xf32, #tpu.memory_space<vmem>>, vector<8x8xf32>
      %c2_139 = arith.constant 2 : index
      %c0_140 = arith.constant 0 : index
      %c0_141 = arith.constant 0 : index
      %179 = vector.load %arg10[%c2_139, %c0_140, %c0_141] : memref<4x8x1xf32, #tpu.memory_space<vmem>>, vector<1x8x1xf32>
      %180 = vector.shape_cast %179 : vector<1x8x1xf32> to vector<8x1xf32>
      %181 = vector.broadcast %180 : vector<8x1xf32> to vector<8x8xf32>
      %182 = arith.divf %178, %181 : vector<8x8xf32>
      %c0_142 = arith.constant 0 : index
      %c16_143 = arith.constant 16 : index
      %183 = vector.load %arg11[%c0_142, %c16_143] : memref<8x32xf32, #tpu.memory_space<vmem>>, vector<8x8xf32>
      tpu.vector_store %arg11[%c0_142, %c16_143], %182 {strides = array<i32>} : memref<8x32xf32, #tpu.memory_space<vmem>>, vector<8x8xf32>,
      %c0_144 = arith.constant 0 : index
      %c24_145 = arith.constant 24 : index
      %184 = vector.load %arg11[%c0_144, %c24_145] : memref<8x32xf32, #tpu.memory_space<vmem>>, vector<8x8xf32>
      %c3_146 = arith.constant 3 : index
      %c0_147 = arith.constant 0 : index
      %c0_148 = arith.constant 0 : index
      %185 = vector.load %arg10[%c3_146, %c0_147, %c0_148] : memref<4x8x1xf32, #tpu.memory_space<vmem>>, vector<1x8x1xf32>
      %186 = vector.shape_cast %185 : vector<1x8x1xf32> to vector<8x1xf32>
      %187 = vector.broadcast %186 : vector<8x1xf32> to vector<8x8xf32>
      %188 = arith.divf %184, %187 : vector<8x8xf32>
      %c0_149 = arith.constant 0 : index
      %c24_150 = arith.constant 24 : index
      %189 = vector.load %arg11[%c0_149, %c24_150] : memref<8x32xf32, #tpu.memory_space<vmem>>, vector<8x8xf32>
      tpu.vector_store %arg11[%c0_149, %c24_150], %188 {strides = array<i32>} : memref<8x32xf32, #tpu.memory_space<vmem>>, vector<8x8xf32>,
      %c0_151 = arith.constant 0 : index
      %c0_152 = arith.constant 0 : index
      %190 = vector.load %arg11[%c0_151, %c0_152] : memref<8x32xf32, #tpu.memory_space<vmem>>, vector<8x32xf32>
      %191 = arith.truncf %190 : vector<8x32xf32> to vector<8x32xbf16>
      %c0_153 = arith.constant 0 : index
      %c0_154 = arith.constant 0 : index
      %192 = vector.load %arg7[%c0_153, %c0_154] : memref<32x32xbf16, #tpu.memory_space<vmem>>, vector<32x32xbf16>
      %cst_155 = arith.constant dense<0.000000e+00> : vector<8x32xf32>
      %193 = tpu.matmul %191, %192, %cst_155 {dimension_numbers = #tpu.dot_dimension_numbers<[1], [0], [0], [1], [0, 0, 1, 1], [], []>} : vector<8x32xbf16>, vector<32x32xbf16>, vector<8x32xf32> -> vector<8x32xf32>
      %c0_156 = arith.constant 0 : index
      %c0_157 = arith.constant 0 : index
      %c0_158 = arith.constant 0 : index
      %194 = vector.load %arg8[%c0_156, %c0_157, %c0_158] : memref<1x8x32xf32, #tpu.memory_space<vmem>>, vector<1x8x32xf32>
      %195 = vector.shape_cast %194 : vector<1x8x32xf32> to vector<8x32xf32>
      %196 = vector.shape_cast %193 : vector<8x32xf32> to vector<1x8x32xf32>
      tpu.vector_store %arg8[%c0_156, %c0_157, %c0_158], %196 {strides = array<i32>} : memref<1x8x32xf32, #tpu.memory_space<vmem>>, vector<1x8x32xf32>,
    } else {
    }
    return
  }
  func.func @transform_0(%arg0: i32, %arg1: i32, %arg2: i32) -> (i32, i32, i32) {
    %c0_i32 = arith.constant 0 : i32
    %c0_i32_0 = arith.constant 0 : i32
    return %arg0, %arg1, %c0_i32 : i32, i32, i32
  }
  func.func @transform_1(%arg0: i32, %arg1: i32, %arg2: i32) -> (i32, i32, i32) {
    %c0_i32 = arith.constant 0 : i32
    %c0_i32_0 = arith.constant 0 : i32
    return %arg0, %arg2, %c0_i32 : i32, i32, i32
  }
  func.func @transform_2(%arg0: i32, %arg1: i32, %arg2: i32) -> (i32, i32, i32) {
    %c0_i32 = arith.constant 0 : i32
    %c0_i32_0 = arith.constant 0 : i32
    return %arg0, %arg2, %c0_i32 : i32, i32, i32
  }
  func.func @transform_3(%arg0: i32, %arg1: i32, %arg2: i32) -> (i32, i32, i32) {
    %c0_i32 = arith.constant 0 : i32
    %c0_i32_0 = arith.constant 0 : i32
    %c0_i32_1 = arith.constant 0 : i32
    return %c0_i32, %c0_i32_0, %arg2 : i32, i32, i32
  }
  func.func @transform_4(%arg0: i32, %arg1: i32, %arg2: i32) -> (i32, i32) {
    %c0_i32 = arith.constant 0 : i32
    %c0_i32_0 = arith.constant 0 : i32
    %c0_i32_1 = arith.constant 0 : i32
    return %c0_i32, %c0_i32_0 : i32, i32
  }
  func.func @transform_5(%arg0: i32, %arg1: i32, %arg2: i32) -> (i32, i32, i32) {
    %c0_i32 = arith.constant 0 : i32
    %c0_i32_0 = arith.constant 0 : i32
    return %arg0, %arg1, %c0_i32 : i32, i32, i32
  }
}

</mosaic_0001>

<bundles_post_ra>
// kernel: multi_head_seq_attention.4
= control target key start
LH: loop header
LB: loop body
LE: loop exit
PB: predicated region body
PF: predicated region fallthrough
CT: control target
= control target key end

     0   :  { %7 = vsyncpa [#allocation4], 0  ;;  %s171_s9 = smov [#allocation3]   ;;  %s211_s0 = inlined_call_operand.vmem [shape: f32[16,32], index: 0, kind: input, shape index: {}]   ;;  %s212_s1 = inlined_call_operand.hbm [shape: bf16[32,32], index: 1, kind: input, shape index: {}]   ;;  %s213_s2 = inlined_call_operand.vmem [shape: bf16[16,32], index: 2, kind: output, shape index: {}]  }
   0x1   :  { %s15_s10 = sshll.u32 %s171_s9, 4  ;;  %s16_s10 = int_to_ptr.vmem [resolvable:$true] %s15_s10 }
   0x2   :  { %s157_s11 = scalar_lea.vmem %s16_s10, 256  ;;  %p162_p1 = scmp.lt.s32.totalorder %s16_s10, %s16_s10 }
   0x3   :  { %p158_p0 = scmp.ne.s32.totalorder %s16_s10, %s157_s11  ;;  %p163_p2 = scmp.lt.s32.totalorder %s157_s11, %s157_s11 }
   0x5   :  { %p164_p3 = por %p163_p2, %p162_p1 }
   0x7   :  { %p165_p4 = pnand %p164_p3, %p158_p0 }
   0x9   :  { %168 = shalt.err (!%p165_p4)
}
   0xa   :  { %s172_s12 = smov 64   ;;  %s173_s13 = smov 4  }
   0xb   :  { %21 = dma.hbm_to_vmem [thread:$0]  %s212_s1, 256, %s16_s10, [#allocation4], %s172_s12, %s172_s12, %s173_s13  }
   0xc   :  { %169 = dma.done.wait [#allocation4], 256  }
   0xd   :  { %170 = vsyncadd [#allocation4], 4294967040  ;;  %vm30_vm0 = vcmask 261120   ;;  %v174_v0 = vmov 0.0   ;;  %vm175_vm1 = vmmov 0   ;;  %v147_v1 = vld [vmem:[#allocation3 + $0x8] sm:$0xff]  }
   0xe   :  { %134 = vmatprep.subr.bf16.mxu0 %v174_v0  ;;  %138 = vmatprep.mubr.msk.bf16.mxu0 %vm175_vm1, %v174_v0  ;;  %31 = vst.msk [vmem:[#allocation2] sm:$0xff] %vm30_vm0, %v174_v0  ;;  %32 = vst.msk [vmem:[#allocation2 + $0x8] sm:$0xff] %vm30_vm0, %v174_v0  ;;  %v148_v2 = vld [vmem:[#allocation3] sm:$0xff]   ;;  %v35_v3 = vld [vmem:[%s211_s0] sm:$0xff]  ;;  %vm116_vm2 = vcmask 257024  }
   0xf   :  { %135 = vmatpush3.bf16.msra.mxu0 %v147_v1  ;;  %v36_v4 = vld [vmem:[%s211_s0 + $0x8] sm:$0xff] }
  0x10   :  { %136 = vmatprep.subr.bf16.mxu0 %v174_v0  ;;  %v37_v5 = vpack.c.bf16 %v36_v4, %v35_v3 }
  0x13   :  { %137 = vmatpush3.bf16.msra.mxu0 %v148_v2 }
  0x15   :  { %v33_v6 = vld [vmem:[#allocation2] sm:$0xff]  ;;  %v34_v10 = vld [vmem:[#allocation2 + $0x8] sm:$0xff] }
  0x16   :  { %139 = vmatmul.mubr.msk.bf16.vlgmr.msra.gmra.mxu0 %vm30_vm0, %v37_v5 }
  0xd6   :  { %v92_v7 = vpop.f32.mrf.mxu0 }
  0xd7   :  { %v99_v8 = vadd.f32 %v92_v7, %v33_v6 }
  0xd8   :  { %v140_v9 = vpop.f32.mrf.mxu0 }
  0xd9   :  { %101 = vst.msk [vmem:[#allocation2] sm:$0xff] %vm30_vm0, %v99_v8 }
  0xda   :  { %v95_v11 = vpop.f32.mrf.mxu0 }
  0xdb   :  { %v100_v12 = vadd.f32 %v95_v11, %v34_v10 }
  0xdc   :  { %v141_v13 = vpop.f32.mrf.mxu0 }
  0xdd   :  { %102 = vst.msk [vmem:[#allocation2 + $0x8] sm:$0xff] %vm30_vm0, %v100_v12 }
  0xe0   :  { %v106_v14 = vld [vmem:[#allocation2] sm:$0xff] }
  0xe1   :  { %v129_v15 = vpack.c.bf16 %v106_v14, %v106_v14 }
  0xe3   :  { %117 = vst.msk [vmem:[%s213_s2] sm:$0xf] %vm116_vm2, %v129_v15 }
  0xe4   :  { %v107_v16 = vld [vmem:[#allocation2 + $0x8] sm:$0xff] }
  0xe5   :  { %v130_v17 = vpack.c.bf16 %v107_v16, %v107_v16 }
  0xe7   :  { %118 = vst.msk [vmem:[%s213_s2 + $0x4] sm:$0xf] %vm116_vm2, %v130_v17 }
  0xe8   :  { %123 = vsyncpa [#allocation4], 1 }

// kernel: multi_head_seq_attention.5
= control target key start
LH: loop header
LB: loop body
LE: loop exit
PB: predicated region body
PF: predicated region fallthrough
CT: control target
= control target key end

     0   :  { %vm16_vm0 = vcmask 261120   ;;  %v170_v1 = vmov 0.0   ;;  %vm134_vm1 = vcmask 257024   ;;  %s226_s1 = inlined_call_operand.vmem [shape: bf16[32,32], index: 1, kind: input, shape index: {}]   ;;  %s227_s0 = inlined_call_operand.vmem [shape: f32[32,32], index: 0, kind: input, shape index: {}]   ;;  %s228_s2 = inlined_call_operand.vmem [shape: bf16[32,32], index: 2, kind: output, shape index: {}]  }
   0x1   :  { %v168_v0 = vld [vmem:[%s226_s1 + $0x8] sm:$0xff]   ;;  %19 = vst.msk [vmem:[#allocation2 + $0x10] sm:$0xff] %vm16_vm0, %v170_v1  ;;  %17 = vst.msk [vmem:[#allocation2] sm:$0xff] %vm16_vm0, %v170_v1  ;;  %v169_v2 = vld [vmem:[%s226_s1] sm:$0xff]  }
   0x2   :  { %18 = vst.msk [vmem:[#allocation2 + $0x8] sm:$0xff] %vm16_vm0, %v170_v1  ;;  %20 = vst.msk [vmem:[#allocation2 + $0x18] sm:$0xff] %vm16_vm0, %v170_v1  ;;  %159 = vmatprep.subr.bf16.mxu0 %v168_v0  ;;  %v25_v3 = vld [vmem:[%s227_s0] sm:$0xff]  ;;  %v26_v4 = vld [vmem:[%s227_s0 + $0x8] sm:$0xff] }
   0x3   :  { %160 = vmatpush3.bf16.msra.mxu0 %v168_v0  ;;  %v29_v5 = vpack.c.bf16 %v26_v4, %v25_v3  ;;  %v27_v6 = vld [vmem:[%s227_s0 + $0x10] sm:$0xff]  ;;  %v28_v7 = vld [vmem:[%s227_s0 + $0x18] sm:$0xff] }
   0x4   :  { %161 = vmatprep.subr.bf16.mxu0 %v169_v2  ;;  %v30_v8 = vpack.c.bf16 %v28_v7, %v27_v6 }
   0x5   :  { %163 = vmatprep.mubr.msk.bf16.mxu0 %vm16_vm0, %v29_v5 }
   0x7   :  { %162 = vmatpush3.bf16.msra.mxu0 %v169_v2 }
   0x8   :  { %v23_v9 = vld [vmem:[#allocation2 + $0x10] sm:$0xff]  ;;  %v21_v11 = vld [vmem:[#allocation2] sm:$0xff] }
   0x9   :  { %v24_v14 = vld [vmem:[#allocation2 + $0x18] sm:$0xff]  ;;  %v22_v17 = vld [vmem:[#allocation2 + $0x8] sm:$0xff] }
   0xa   :  { %164 = vmatmul.mubr.msk.bf16.vlgmr.msra.gmra.mxu0 %vm16_vm0, %v30_v8 }
  0xca   :  { %v165_v10 = vpop.f32.mrf.mxu0 }
  0xcb   :  { %v105_v12 = vadd.f32 %v165_v10, %v23_v9 }
  0xcc   :  { %v88_v13 = vpop.f32.mrf.mxu0 }
  0xcd   :  { %109 = vst.msk [vmem:[#allocation2 + $0x10] sm:$0xff] %vm16_vm0, %v105_v12  ;;  %v103_v15 = vadd.f32 %v88_v13, %v21_v11 }
  0xce   :  { %v166_v16 = vpop.f32.mrf.mxu0 }
  0xcf   :  { %107 = vst.msk [vmem:[#allocation2] sm:$0xff] %vm16_vm0, %v103_v15  ;;  %v106_v18 = vadd.f32 %v166_v16, %v24_v14 }
  0xd0   :  { %v91_v19 = vpop.f32.mrf.mxu0 }
  0xd1   :  { %110 = vst.msk [vmem:[#allocation2 + $0x18] sm:$0xff] %vm16_vm0, %v106_v18  ;;  %v104_v20 = vadd.f32 %v91_v19, %v22_v17 }
  0xd3   :  { %108 = vst.msk [vmem:[#allocation2 + $0x8] sm:$0xff] %vm16_vm0, %v104_v20 }
  0xd4   :  { %v116_v21 = vld [vmem:[#allocation2 + $0x10] sm:$0xff] }
  0xd5   :  { %v153_v22 = vpack.c.bf16 %v116_v21, %v116_v21 }
  0xd6   :  { %v114_v23 = vld [vmem:[#allocation2] sm:$0xff] }
  0xd7   :  { %137 = vst.msk [vmem:[%s228_s2 + $0x8] sm:$0xf] %vm134_vm1, %v153_v22  ;;  %v151_v24 = vpack.c.bf16 %v114_v23, %v114_v23 }
  0xd8   :  { %v117_v25 = vld [vmem:[#allocation2 + $0x18] sm:$0xff] }
  0xd9   :  { %135 = vst.msk [vmem:[%s228_s2] sm:$0xf] %vm134_vm1, %v151_v24  ;;  %v154_v26 = vpack.c.bf16 %v117_v25, %v117_v25 }
  0xda   :  { %v115_v27 = vld [vmem:[#allocation2 + $0x8] sm:$0xff] }
  0xdb   :  { %138 = vst.msk [vmem:[%s228_s2 + $0xc] sm:$0xf] %vm134_vm1, %v154_v26  ;;  %v152_v28 = vpack.c.bf16 %v115_v27, %v115_v27 }
  0xdd   :  { %136 = vst.msk [vmem:[%s228_s2 + $0x4] sm:$0xf] %vm134_vm1, %v152_v28 }

// kernel: multi_head_seq_attention.7
= control target key start
LH: loop header
LB: loop body
LE: loop exit
PB: predicated region body
PF: predicated region fallthrough
CT: control target
= control target key end

     0   :  { %10 = vsyncpa [#allocation6], 0  ;;  %s1878_s0 = inlined_call_operand.vmem [shape: bf16[2,8,32], index: 0, kind: input, shape index: {}]   ;;  %s1879_s1 = inlined_call_operand.vmem [shape: bf16[2,16,32], index: 1, kind: input, shape index: {}]   ;;  %s1880_s2 = inlined_call_operand.vmem [shape: bf16[2,16,32], index: 2, kind: input, shape index: {}]   ;;  %s1881_s3 = inlined_call_operand.vmem [shape: f32[4,1,16], index: 3, kind: input, shape index: {}]   ;;  %s1882_s4 = inlined_call_operand.vmem [shape: bf16[32,32], index: 4, kind: input, shape index: {}]   ;;  %s1883_s5 = inlined_call_operand.hbm [shape: f32[2,8,32], index: 5, kind: output, shape index: {}]  }
   0x1   :  { %12 = vsyncpa [#allocation6 + $0x1], 0  ;;  %s1584_s18 = smov 0   ;;  %s1586_s19 = smov 0  }
   0x2   :  { %s1588_s20 = smov 0   ;;  %s1590_s21 = smov 0  }
   0x3   :  { %s1592_s22 = smov 0   ;;  %s1594_s23 = smov 0  }
   0x4 LB: > { %s1239_s24 = sadd.s32 4294967295, %s1541_s23   ;;  %s1240_s25 = sadd.s32 4294967294, %s1541_s23   ;;  %s1541_s23 = sphi %s1594_s23, %s18_s23   ;;  %s1537_s22 = sphi %s1592_s22, %s1890_s22   ;;  %s1533_s21 = sphi %s1590_s21, %s1889_s21   ;;  %s1529_s20 = sphi %s1588_s20, %s1888_s20   ;;  %s1525_s19 = sphi %s1586_s19, %s1887_s19   ;;  %s1521_s18 = sphi %s1584_s18, %s1886_s18  }
   0x5   : > { %s37_s26 = sadd.s32 1, %s1537_s22  ;;  %s177_s27 = sadd.s32 1, %s1529_s20 }
   0x6   : > { %p39_p0 = scmp.ge.s32.totalorder %s37_s26, 2  ;;  %p187_p1 = scmp.ne.s32.totalorder %s1529_s20, %s1525_s19 }
   0x7   : > { %p188_p2 = scmp.eq.s32.totalorder %s1239_s24, 1  ;;  %p193_p3 = scmp.ne.s32.totalorder %s1525_s19, %s1521_s18 }
   0x8   : > { %s1892_s26 = smov (%p39_p0, %s37_s26), 0  ;;  %p194_p5 = scmp.eq.s32.totalorder %s1240_s25, 1 }
   0x9   : > { %p1624_p4 = por %p188_p2, %p187_p1  ;;  %s172_s29 = ssub.s32 %s1537_s22, %s1892_s26 }
   0xa   : > { %p1244_p6 = scmp.ge.s32.totalorder %s1541_s23, 1  ;;  %p175_p7 = scmp.eq.s32.totalorder %s172_s29, 0 }
   0xb   : > { %p1631_p8 = por %p194_p5, %p193_p3  ;;  %p257_p9 = scmp.lt.s32.totalorder %s1541_s23, 3 }
   0xc   : > { %s1637_s6 = scalar_select %p175_p7, %s1529_s20, %s177_s27  }
   0xd   : > { %p258_p10 = pnand %p1244_p6, %p257_p9 }
   0xe   : > { %p308_p11 = scmp.lt.s32.totalorder (!%p258_p10), %s1533_s21, 1  ;;  %s1547_s16 = smov (!%p258_p10), 120  }
   0xf   : > { %261 = sbr.rel (%p258_p10) target bundleno = 1594 (0x63a), region = 40  ;;  %s1548_s17 = smov (!%p258_p10), 112  }
  0x10   : > { %s1549_s24 = smov (!%p258_p10), 104  }
  0x14   : > { %v1543_v0 = vmov 0.0   ;;  %vm1544_vm0 = vmmov 0   ;;  %s1644_s7 = scalar_select %p308_p11, %s1533_s21, 1  ;;  %vm362_vm1 = vcmask 64512   ;;  %vm343_vm2 = vcmask 7168  }
  0x15   : > { %1305 = vmatprep.subr.bf16.mxu0 %v1543_v0  ;;  %1307 = vmatprep.mubr.msk.bf16.mxu0 %vm1544_vm0, %v1543_v0  ;;  %v1545_v4 = vmov -inf   ;;  %348 = vst.msk [vmem:[#allocation3] sm:$0xff] %vm343_vm2, %v1543_v0  ;;  %349 = vst.msk [vmem:[#allocation3 + $0x8] sm:$0xff] %vm343_vm2, %v1543_v0  ;;  %vm410_vm3 = vcmask 130048   ;;  %v1546_v10 = vmov 0   ;;  %vm352_vm4 = vcmask 261120  }
  0x16   : > { %1311 = vmatprep.subr.bf16.mxu1 %v1543_v0  ;;  %1313 = vmatprep.mubr.msk.bf16.mxu1 %vm1544_vm0, %v1543_v0  ;;  %s1284_s8 = sshll.u32 %s1644_s7, 3  ;;  %s1246_s9 = sshll.u32 %s1644_s7, 2  ;;  %344 = vst.msk [vmem:[#allocation2] sm:$0xff] %vm343_vm2, %v1545_v4  ;;  %345 = vst.msk [vmem:[#allocation2 + $0x8] sm:$0xff] %vm343_vm2, %v1545_v4  ;;  %v1253_v26 = vld [vmem:[%s1881_s3] ss:$0 sm:$0xff] }
  0x17   : > { %s1656_s12 = scalar_lea.vmem %s1879_s1, %s1284_s8  ;;  %s1662_s15 = scalar_lea.vmem %s1878_s0, %s1246_s9  ;;  %346 = vst.msk [vmem:[#allocation2 + $0x10] sm:$0xff] %vm343_vm2, %v1545_v4  ;;  %347 = vst.msk [vmem:[#allocation2 + $0x18] sm:$0xff] %vm343_vm2, %v1545_v4  ;;  %1426 = vset.pattern.permute.xlu0 %v1546_v10  ;;  %1427 = vset.pattern.permute.xlu1 %v1546_v10  ;;  %vm665_vm5 = vcmask 130112   ;;  %vm829_vm6 = vcmask 195712   ;;  %vm993_vm7 = vcmask 261312  }
  0x18   : > { %v1428_v1 = vld [vmem:[%s1656_s12] sm:$0xff]   ;;  %350 = vst.msk [vmem:[#allocation3 + $0x10] sm:$0xff] %vm343_vm2, %v1543_v0  ;;  %351 = vst.msk [vmem:[#allocation3 + $0x18] sm:$0xff] %vm343_vm2, %v1543_v0  ;;  %s1710_s29 = scalar_lea.vmem %s1880_s2, %s1284_s8  ;;  %s305_s9 = sand.u32 1, %s1525_s19  }
  0x19   : > { %v367_v2 = vsel %vm362_vm1, %v1428_v1, 0  ;;  %v354_v3 = vld [vmem:[%s1662_s15] sm:$0xf]  ;;  %353 = vst.msk [vmem:[#allocation4] sm:$0xff] %vm352_vm4, %v1543_v0  ;;  %s1245_s10 = sshll.u32 %s305_s9, 3  ;;  %s1281_s7 = sshll.u32 %s1533_s21, 7 }
  0x1a   : > { %1306 = vmatpush3.bf16.xpose.msra.mxu0 %v367_v2  ;;  %v1429_v11 = vld [vmem:[%s1656_s12] sm:$0xff]   ;;  %s307_s8 = scalar_lea.vmem [#allocation5], %s1245_s10  ;;  %s1831_s14 = scalar_lea.hbm %s1883_s5, %s1281_s7 }
  0x1b   : > { %1323 = vmatprep.subr.bf16.mxu0 %v1543_v0  ;;  %517 = vrot.lane.b32.xlu1 %v1429_v11, %s1547_s16  ;;  %v1430_v12 = vld [vmem:[%s1662_s15] ss:$0 sps:$4 sm:$0xff]   ;;  %s1117_s11 = sshll.u32 %s307_s8, 4  ;;  %s1553_s21 = smov [#allocation5]   ;;  %s1833_s11 = int_to_ptr.vmem [resolvable:$true] %s1117_s11 }
  0x1c   : > { %v1431_v13 = vld [vmem:[%s1656_s12] sm:$0xff]  }
  0x1d   : > { %v1432_v14 = vld [vmem:[%s1662_s15] ss:$0 sps:$4 sm:$0xff]   ;;  %v566_v57 = vld [vmem:[#allocation2 + $0x8] sm:$0xff] }
  0x1e   : > { %v1433_v15 = vld [vmem:[%s1656_s12] sm:$0xff]   ;;  %v1745_v61 = vld [vmem:[#allocation2 + $0x10] sm:$0xff]  ;;  %v1756_v2 = vld [vmem:[#allocation2 + $0x18] sm:$0xff] }
  0x1f   : > { %510 = vrot.lane.b32.xlu1 %v1430_v12, %s1547_s16  ;;  %v1434_v16 = vld [vmem:[%s1662_s15] ss:$0 sps:$4 sm:$0xff]   ;;  %s1550_s15 = smov 8  }
  0x20   : > { %v1695_v17 = vld [vmem:[#allocation2] sm:$0xff] }
  0x21   : > { %1308 = vmatmul.mubr.msk.bf16.vlgmr.msra.gmra.mxu0 %vm362_vm1, %v354_v3  ;;  %v1435_v21 = vld [vmem:[%s1710_s29] sm:$0xff]  }
  0x22   : > { %1325 = vmatprep.mubr.msk.bf16.mxu0 %vm1544_vm0, %v1543_v0  ;;  %1312 = vmatpush3.bf16.msra.mxu1 %v1435_v21  ;;  %v1436_v60 = vld [vmem:[%s1710_s29] sm:$0xff]  }
  0x23   : > { %681 = vrot.lane.b32.xlu1 %v1431_v13, %s1548_s17  ;;  %1317 = vmatprep.subr.bf16.mxu1 %v1543_v0 }
  0x27   : > { %674 = vrot.lane.b32.xlu1 %v1432_v14, %s1548_s17 }
  0x2b   : > { %845 = vrot.lane.b32.xlu1 %v1433_v15, %s1549_s24 }
  0x2f   : > { %838 = vrot.lane.b32.xlu1 %v1434_v16, %s1549_s24 }
  0x8d   : > { %v518_v25 = vpop.permute.xlu1 %517 }
  0x8e   : > { %v523_v30 = vsel %vm362_vm1, %v518_v25, 0 }
  0x91   : > { %v511_v27 = vpop.permute.xlu1 %510 }
  0x95   : > { %v682_v32 = vpop.permute.xlu1 %681 }
  0x96   : > { %v687_v34 = vsel %vm362_vm1, %v682_v32, 0 }
  0x99   : > { %v675_v33 = vpop.permute.xlu1 %674 }
  0x9d   : > { %v846_v35 = vpop.permute.xlu1 %845 }
  0x9e   : > { %v851_v36 = vsel %vm362_vm1, %v846_v35, 0 }
  0xa1   : > { %v839_v37 = vpop.permute.xlu1 %838 }
  0xe1   : > { %v403_v5 = vpop.f32.mrf.mxu0 }
  0xe2   : > { %v411_v6 = vsel %vm410_vm3, %v403_v5, -inf }
  0xe3   : > { %412 = vmax.xlane.f32.xlu0 %v411_v6  ;;  %v1309_v7 = vpop.f32.mrf.mxu0  ;;  %v1437_v6 = vld [vmem:[%s1710_s29] sm:$0xff]  }
  0xe4   : > { %v1438_v7 = vld [vmem:[%s1710_s29] sm:$0xff]  }
  0xe5   : > { %v406_v8 = vpop.f32.mrf.mxu0 }
  0xe7   : > { %v1310_v9 = vpop.f32.mrf.mxu0 }
 0x16c   : > { %v413_v18 = vpop.xlane.xlu0 %412 }
 0x16d   : > { %v1698_v19 = vmax.f32 %v1695_v17, %v413_v18 }
 0x16f   : > { %v415_v20 = vsub.f32 %v1695_v17, %v1698_v19  ;;  %503 = vst.msk [vmem:[#allocation2] sm:$0xff] %vm343_vm2, %v1698_v19  ;;  %420 = vperm.xlu0 %1426, %v1698_v19  }
 0x1ea   : > { %v421_v22 = vpop.permute.xlu0 %420 }
 0x1eb   : > { %v423_v23 = vsub.f32 %v403_v5, %v421_v22 }
 0x1ed   : > { %v424_v24 = vmul.f32 1.442695, %v423_v23  ;;  %v1260_v23 = vld [vmem:[%s1881_s3 + $0x1] ss:$0 sm:$0xff] }
 0x1ef   : > { %1441 = vpow2.f32 %v424_v24 }
 0x1fc   : > { %v1717_v28 = vpop.eup %1441 }
 0x1fd   : > { %v441_v29 = vmul.f32 %v1717_v28, %v1253_v26  ;;  %v428_v10 = vsel %vm410_vm3, %v1717_v28, 0.0 }
 0x1ff   : > { %v442_v31 = vpack.c.bf16 %v441_v29, %v441_v29 }
 0x201   : > { %1314 = vmatmul.mubr.msk.bf16.vlgmr.msra.gmra.mxu1 %vm410_vm3, %v442_v31  ;;  %v1267_v31 = vld [vmem:[%s1881_s3 + $0x2] ss:$0 sm:$0xff] }
 0x202   : > { %1318 = vmatpush3.bf16.xpose.msra.mxu1 %v523_v30  ;;  %1319 = vmatprep.mubr.msk.bf16.mxu1 %vm1544_vm0, %v1543_v0 }
 0x203   : > { %1329 = vmatprep.subr.bf16.mxu1 %v1543_v0 }
 0x209   : > { %1320 = vmatmul.mubr.msk.bf16.vlgmr.msra.gmra.mxu1 %vm362_vm1, %v511_v27 }
 0x20a   : > { %1330 = vmatpush3.bf16.xpose.msra.mxu1 %v687_v34  ;;  %1331 = vmatprep.mubr.msk.bf16.mxu1 %vm1544_vm0, %v1543_v0 }
 0x20b   : > { %1341 = vmatprep.subr.bf16.mxu1 %v1543_v0 }
 0x211   : > { %1332 = vmatmul.mubr.msk.bf16.vlgmr.msra.gmra.mxu1 %vm362_vm1, %v675_v33 }
 0x212   : > { %1342 = vmatpush3.bf16.xpose.msra.mxu1 %v851_v36  ;;  %1343 = vmatprep.mubr.msk.bf16.mxu1 %vm1544_vm0, %v1543_v0 }
 0x213   : > { %1353 = vmatprep.subr.bf16.mxu1 %v1543_v0 }
 0x219   : > { %1344 = vmatmul.mubr.msk.bf16.vlgmr.msra.gmra.mxu1 %vm362_vm1, %v839_v37  ;;  %v416_v37 = vmul.f32 1.442695, %v415_v20  ;;  %v426_v20 = vld [vmem:[#allocation3] sm:$0xff] }
 0x21a   : > { %1357 = vmatprep.mubr.msk.bf16.mxu1 %vm1544_vm0, %v1543_v0 }
 0x2c1   : > { %v1738_v38 = vpop.f32.mrf.mxu1 }
 0x2c3   : > { %v1315_v39 = vpop.f32.mrf.mxu1 }
 0x2c4   : > { %v1274_v39 = vld [vmem:[%s1881_s3 + $0x3] ss:$0 sm:$0xff] }
 0x2c5   : > { %v498_v40 = vpop.f32.mrf.mxu1 }
 0x2c7   : > { %v1316_v41 = vpop.f32.mrf.mxu1 }
 0x2c9   : > { %v559_v42 = vpop.f32.mrf.mxu1 }
 0x2ca   : > { %v567_v43 = vsel %vm410_vm3, %v559_v42, -inf }
 0x2cb   : > { %568 = vmax.xlane.f32.xlu1 %v567_v43  ;;  %v1321_v44 = vpop.f32.mrf.mxu1 }
 0x2cd   : > { %v562_v45 = vpop.f32.mrf.mxu1 }
 0x2cf   : > { %v1322_v46 = vpop.f32.mrf.mxu1 }
 0x2d1   : > { %v723_v47 = vpop.f32.mrf.mxu1 }
 0x2d2   : > { %v731_v48 = vsel %vm410_vm3, %v723_v47, -inf }
 0x2d3   : > { %732 = vmax.xlane.f32.xlu0 %v731_v48  ;;  %v1333_v49 = vpop.f32.mrf.mxu1 }
 0x2d5   : > { %v726_v50 = vpop.f32.mrf.mxu1 }
 0x2d6   : > { %v583_v50 = vld [vmem:[#allocation3 + $0x8] sm:$0xff] }
 0x2d7   : > { %v1334_v51 = vpop.f32.mrf.mxu1 }
 0x2d9   : > { %v887_v52 = vpop.f32.mrf.mxu1 }
 0x2da   : > { %v895_v53 = vsel %vm410_vm3, %v887_v52, -inf }
 0x2db   : > { %896 = vmax.xlane.f32.xlu1 %v895_v53  ;;  %v1345_v54 = vpop.f32.mrf.mxu1 }
 0x2dc   : > { %v747_v54 = vld [vmem:[#allocation3 + $0x10] sm:$0xff] }
 0x2dd   : > { %v890_v55 = vpop.f32.mrf.mxu1 }
 0x2df   : > { %v1346_v56 = vpop.f32.mrf.mxu1 }
 0x354   : > { %v569_v58 = vpop.xlane.xlu1 %568 }
 0x355   : > { %v570_v59 = vmax.f32 %v566_v57, %v569_v58 }
 0x357   : > { %667 = vst.msk [vmem:[#allocation2 + $0x8] sm:$0xff] %vm343_vm2, %v570_v59  ;;  %576 = vperm.xlu1 %1427, %v570_v59   ;;  %v571_v8 = vsub.f32 %v566_v57, %v570_v59 }
 0x359   : > { %v572_v9 = vmul.f32 1.442695, %v571_v8 }
 0x35b   : > { %614 = vrot.lane.b32.xlu1 %v1436_v60, %s1547_s16  ;;  %1443 = vpow2.f32 %v572_v9  ;;  %v911_v60 = vld [vmem:[#allocation3 + $0x18] sm:$0xff]  ;;  %s1551_s16 = smov 16  }
 0x35c   : > { %v733_v62 = vpop.xlane.xlu0 %732 }
 0x35d   : > { %v1749_v63 = vmax.f32 %v1745_v61, %v733_v62 }
 0x35f   : > { %v735_v1 = vsub.f32 %v1745_v61, %v1749_v63  ;;  %831 = vst.msk [vmem:[#allocation2 + $0x10] sm:$0xff] %vm343_vm2, %v1749_v63  ;;  %740 = vperm.xlu0 %1426, %v1749_v63   ;;  %v443_v61 = vld [vmem:[#allocation4] sm:$0xff] }
 0x361   : > { %v736_v43 = vmul.f32 1.442695, %v735_v1 }
 0x364   : > { %v897_v3 = vpop.xlane.xlu1 %896 }
 0x365   : > { %v1759_v4 = vmax.f32 %v1756_v2, %v897_v3 }
 0x367   : > { %v899_v5 = vsub.f32 %v1756_v2, %v1759_v4  ;;  %995 = vst.msk [vmem:[#allocation2 + $0x18] sm:$0xff] %vm343_vm2, %v1759_v4  ;;  %904 = vperm.xlu1 %1427, %v1759_v4  }
 0x368   : > { %v1772_v11 = vpop.eup %1443 }
 0x369   : > { %v900_v49 = vmul.f32 1.442695, %v899_v5  ;;  %v584_v51 = vmul.f32 %v1772_v11, %v583_v50 }
 0x36b   : > { %778 = vrot.lane.b32.xlu1 %v1437_v6, %s1548_s17  ;;  %s1552_s17 = smov 24  }
 0x36f   : > { %942 = vrot.lane.b32.xlu1 %v1438_v7, %s1549_s24 }
 0x393   : > { %429 = vadd.xlane.f32.xlu1 %v428_v10 }
 0x3a4   : > { %603 = vperm.xlu1 %1427, %v1772_v11  }
 0x3d2   : > { %v577_v12 = vpop.permute.xlu1 %576 }
 0x3d3   : > { %v579_v13 = vsub.f32 %v559_v42, %v577_v12 }
 0x3d5   : > { %v580_v14 = vmul.f32 1.442695, %v579_v13 }
 0x3d6   : > { %v615_v15 = vpop.permute.xlu1 %614 }
 0x3d7   : > { %1445 = vpow2.f32 %v580_v14  ;;  %1324 = vmatpush3.bf16.msra.mxu0 %v615_v15 }
 0x3d8   : > { %1335 = vmatprep.subr.bf16.mxu0 %v1543_v0 }
 0x3da   : > { %v741_v16 = vpop.permute.xlu0 %740 }
 0x3db   : > { %v743_v18 = vsub.f32 %v723_v47, %v741_v16 }
 0x3dd   : > { %v744_v21 = vmul.f32 1.442695, %v743_v18 }
 0x3df   : > { %1447 = vpow2.f32 %v744_v21 }
 0x3e2   : > { %v905_v22 = vpop.permute.xlu1 %904 }
 0x3e3   : > { %v907_v24 = vsub.f32 %v887_v52, %v905_v22  ;;  %v1439_v22 = vld [vmem:[%s1882_s4 + $0x8] sm:$0xff]  }
 0x3e4   : > { %v1446_v25 = vpop.eup %1445  ;;  %1354 = vmatpush3.bf16.msra.mxu1 %v1439_v22 }
 0x3e5   : > { %v908_v26 = vmul.f32 1.442695, %v907_v24  ;;  %v585_v27 = vsel %vm410_vm3, %v1446_v25, 0.0  ;;  %v598_v28 = vmul.f32 %v1446_v25, %v1260_v23  ;;  %v1440_v23 = vld [vmem:[%s1882_s4] sm:$0xff]   ;;  %1355 = vmatprep.subr.bf16.mxu1 %v1543_v0 }
 0x3e6   : > { %586 = vadd.xlane.f32.xlu0 %v585_v27  ;;  %v779_v30 = vpop.permute.xlu1 %778 }
 0x3e7   : > { %1449 = vpow2.f32 %v908_v26  ;;  %v599_v29 = vpack.c.bf16 %v598_v28, %v598_v28 }
 0x3e8   : > { %1451 = vpow2.f32 %v416_v37  ;;  %1356 = vmatpush3.bf16.msra.mxu1 %v1440_v23 }
 0x3e9   : > { %1326 = vmatmul.mubr.msk.bf16.vlgmr.msra.gmra.mxu0 %vm410_vm3, %v599_v29  ;;  %1453 = vpow2.f32 %v736_v43 }
 0x3ea   : > { %1336 = vmatpush3.bf16.msra.mxu0 %v779_v30  ;;  %1337 = vmatprep.mubr.msk.bf16.mxu0 %vm1544_vm0, %v1543_v0  ;;  %v943_v36 = vpop.permute.xlu1 %942  ;;  %1455 = vpow2.f32 %v900_v49 }
 0x3eb   : > { %1347 = vmatprep.subr.bf16.mxu0 %v1543_v0 }
 0x3ec   : > { %v1448_v32 = vpop.eup %1447 }
 0x3ed   : > { %v749_v33 = vsel %vm410_vm3, %v1448_v32, 0.0  ;;  %v762_v34 = vmul.f32 %v1448_v32, %v1267_v31 }
 0x3ee   : > { %750 = vadd.xlane.f32.xlu0 %v749_v33 }
 0x3ef   : > { %v763_v35 = vpack.c.bf16 %v762_v34, %v762_v34 }
 0x3f1   : > { %1338 = vmatmul.mubr.msk.bf16.vlgmr.msra.gmra.mxu0 %vm410_vm3, %v763_v35 }
 0x3f2   : > { %1348 = vmatpush3.bf16.msra.mxu0 %v943_v36  ;;  %1349 = vmatprep.mubr.msk.bf16.mxu0 %vm1544_vm0, %v1543_v0 }
 0x3f4   : > { %v1450_v40 = vpop.eup %1449 }
 0x3f5   : > { %v913_v41 = vsel %vm410_vm3, %v1450_v40, 0.0  ;;  %v926_v42 = vmul.f32 %v1450_v40, %v1274_v39  ;;  %v1452_v17 = vpop.eup %1451 }
 0x3f6   : > { %914 = vadd.xlane.f32.xlu1 %v913_v41  ;;  %v1454_v19 = vpop.eup %1453  ;;  %v427_v45 = vmul.f32 %v1452_v17, %v426_v20 }
 0x3f7   : > { %v927_v44 = vpack.c.bf16 %v926_v42, %v926_v42  ;;  %v748_v55 = vmul.f32 %v1454_v19, %v747_v54  ;;  %v1456_v58 = vpop.eup %1455 }
 0x3f8   : > { %v912_v62 = vmul.f32 %v1456_v58, %v911_v60 }
 0x3f9   : > { %1350 = vmatmul.mubr.msk.bf16.vlgmr.msra.gmra.mxu0 %vm410_vm3, %v927_v44 }
 0x404   : > { %446 = vperm.xlu0 %1426, %v1452_v17  }
 0x408   : > { %767 = vperm.xlu0 %1426, %v1454_v19  }
 0x41c   : > { %v430_v46 = vpop.xlane.xlu1 %429 }
 0x41d   : > { %v431_v47 = vadd.f32 %v430_v46, %v427_v45 }
 0x41f   : > { %433 = vst.msk [vmem:[#allocation3] sm:$0xff] %vm343_vm2, %v431_v47 }
 0x420   : > { %v604_v59 = vpop.permute.xlu1 %603 }
 0x426   : > { %v1000_v48 = vld [vmem:[#allocation3] sm:$0xff] }
 0x427   : > { %1003 = vperm.xlu0 %1426, %v1000_v48  }
 0x46f   : > { %v587_v52 = vpop.xlane.xlu0 %586 }
 0x470   : > { %v588_v53 = vadd.f32 %v587_v52, %v584_v51 }
 0x472   : > { %589 = vst.msk [vmem:[#allocation3 + $0x8] sm:$0xff] %vm343_vm2, %v588_v53 }
 0x477   : > { %v751_v56 = vpop.xlane.xlu0 %750 }
 0x478   : > { %v752_v57 = vadd.f32 %v751_v56, %v748_v55 }
 0x479   : > { %v1010_v14 = vld [vmem:[#allocation3 + $0x8] sm:$0xff] }
 0x47a   : > { %753 = vst.msk [vmem:[#allocation3 + $0x10] sm:$0xff] %vm343_vm2, %v752_v57 }
 0x47f   : > { %v915_v63 = vpop.xlane.xlu1 %914  ;;  %v447_v1 = vpop.permute.xlu0 %446 }
 0x480   : > { %v916_v2 = vadd.f32 %v915_v63, %v912_v62  ;;  %v449_v3 = vmul.f32 %v447_v1, %v443_v61 }
 0x481   : > { %v1020_v18 = vld [vmem:[#allocation3 + $0x10] sm:$0xff] }
 0x482   : > { %917 = vst.msk [vmem:[#allocation3 + $0x18] sm:$0xff] %vm343_vm2, %v916_v2  ;;  %v501_v4 = vadd.f32 %v1738_v38, %v449_v3 }
 0x483   : > { %v768_v28 = vpop.permute.xlu0 %767 }
 0x484   : > { %502 = vst.msk [vmem:[#allocation4] sm:$0xff] %vm362_vm1, %v501_v4 }
 0x489   : > { %v1030_v16 = vld [vmem:[#allocation3 + $0x18] sm:$0xff] }
 0x48b   : > { %v600_v24 = vld [vmem:[#allocation4] sm:$0xff] }
 0x48c   : > { %v606_v25 = vmul.f32 %v604_v59, %v600_v24 }
 0x4a2   : > { %v1004_v33 = vpop.permute.xlu0 %1003 }
 0x4a3   : > { %1457 = vrcp.f32 %v1004_v33 }
 0x4a9   : > { %v654_v5 = vpop.f32.mrf.mxu0 }
 0x4aa   : > { %661 = vrot.lane.b32.xlu1 %v654_v5, %s1550_s15  ;;  %s1103_s15 = scalar_lea.sflag [#allocation6], %s305_s9 }
 0x4ab   : > { %v1327_v6 = vpop.f32.mrf.mxu0 }
 0x4ad   : > { %v657_v7 = vpop.f32.mrf.mxu0 }
 0x4af   : > { %v1328_v8 = vpop.f32.mrf.mxu0 }
 0x4b0   : > { %v1458_v40 = vpop.eup %1457 }
 0x4b1   : > { %v818_v9 = vpop.f32.mrf.mxu0 }
 0x4b2   : > { %825 = vrot.lane.b32.xlu1 %v818_v9, %s1551_s16  ;;  %s1465_s16 = scalar_lea.vmem %s1833_s11, 128 }
 0x4b3   : > { %v1339_v10 = vpop.f32.mrf.mxu0  ;;  %p1466_p12 = scmp.ne.s32.totalorder %s1833_s11, %s1465_s16 }
 0x4b5   : > { %v821_v11 = vpop.f32.mrf.mxu0  ;;  %p1467_p13 = pnand %p1466_p12, %p1624_p4 }
 0x4b6   : > { %931 = vperm.xlu1 %1427, %v1456_v58  }
 0x4b7   : > { %v1340_v12 = vpop.f32.mrf.mxu0  ;;  %p1468_p0 = pneg %p1467_p13 }
 0x4b9   : > { %v982_v13 = vpop.f32.mrf.mxu0 }
 0x4ba   : > { %1013 = vperm.xlu1 %1427, %v1010_v14   ;;  %989 = vrot.lane.b32.xlu0 %v982_v13, %s1552_s17  ;;  %s1469_s17 = sshll.u32 %s1553_s21, 4  ;;  %s1470_s17 = int_to_ptr.vmem [resolvable:$false] %s1469_s17 }
 0x4bb   : > { %v1351_v38 = vpop.f32.mrf.mxu0  ;;  %s1471_s24 = scalar_lea.vmem %s1470_s17, 256  ;;  %p1472_p1 = scmp.lt.s32.totalorder %s1833_s11, %s1470_s17 }
 0x4bc   : > { %p1473_p2 = scmp.lt.s32.totalorder %s1471_s24, %s1465_s16 }
 0x4bd   : > { %v985_v15 = vpop.f32.mrf.mxu0 }
 0x4be   : > { %1033 = vperm.xlu1 %1427, %v1030_v16   ;;  %1023 = vperm.xlu0 %1426, %v1020_v18   ;;  %p1474_p3 = por %p1473_p2, %p1472_p1 }
 0x4bf   : > { %v1352_v21 = vpop.f32.mrf.mxu0 }
 0x4c0   : > { %p1475_p5 = pnand %p1474_p3, %p1468_p0 }
 0x51c   : > { %v662_v26 = vpop.permute.xlu1 %661 }
 0x51d   : > { %v664_v27 = vadd.f32 %v662_v26, %v606_v25 }
 0x51f   : > { %666 = vst.msk [vmem:[#allocation4] sm:$0xff] %vm665_vm5, %v664_v27 }
 0x524   : > { %v826_v31 = vpop.permute.xlu1 %825 }
 0x526   : > { %v764_v29 = vld [vmem:[#allocation4] sm:$0xff] }
 0x527   : > { %v770_v30 = vmul.f32 %v768_v28, %v764_v29 }
 0x529   : > { %v828_v32 = vadd.f32 %v826_v31, %v770_v30 }
 0x52b   : > { %830 = vst.msk [vmem:[#allocation4] sm:$0xff] %vm829_vm6, %v828_v32 }
 0x52c   : > { %v990_v36 = vpop.permute.xlu0 %989 }
 0x531   : > { %v932_v34 = vpop.permute.xlu1 %931 }
 0x532   : > { %v928_v0 = vld [vmem:[#allocation4] sm:$0xff] }
 0x533   : > { %v934_v35 = vmul.f32 %v932_v34, %v928_v0 }
 0x535   : > { %v992_v37 = vadd.f32 %v990_v36, %v934_v35  ;;  %v1014_v39 = vpop.permute.xlu1 %1013 }
 0x536   : > { %1459 = vrcp.f32 %v1014_v39 }
 0x537   : > { %994 = vst.msk [vmem:[#allocation4] sm:$0xff] %vm993_vm7, %v992_v37 }
 0x539   : > { %v1024_v43 = vpop.permute.xlu0 %1023  ;;  %v1034_v20 = vpop.permute.xlu1 %1033 }
 0x53a   : > { %1461 = vrcp.f32 %v1024_v43 }
 0x53b   : > { %1463 = vrcp.f32 %v1034_v20 }
 0x53e   : > { %v999_v41 = vld [vmem:[#allocation4] sm:$0xff] }
 0x53f   : > { %v1007_v42 = vmul.f32 %v1458_v40, %v999_v41 }
 0x541   : > { %1008 = vst.msk [vmem:[#allocation4] sm:$0xff] %vm362_vm1, %v1007_v42 }
 0x543   : > { %v1460_v44 = vpop.eup %1459 }
 0x547   : > { %v1462_v45 = vpop.eup %1461 }
 0x548   : > { %v1009_v17 = vld [vmem:[#allocation4] sm:$0xff]  ;;  %v1464_v48 = vpop.eup %1463 }
 0x549   : > { %v1017_v19 = vmul.f32 %v1460_v44, %v1009_v17 }
 0x54b   : > { %1018 = vst.msk [vmem:[#allocation4] sm:$0xff] %vm665_vm5, %v1017_v19 }
 0x552   : > { %v1019_v46 = vld [vmem:[#allocation4] sm:$0xff] }
 0x553   : > { %v1027_v47 = vmul.f32 %v1462_v45, %v1019_v46 }
 0x555   : > { %1028 = vst.msk [vmem:[#allocation4] sm:$0xff] %vm829_vm6, %v1027_v47 }
 0x55c   : > { %v1029_v49 = vld [vmem:[#allocation4] sm:$0xff] }
 0x55d   : > { %v1037_v50 = vmul.f32 %v1464_v48, %v1029_v49 }
 0x55f   : > { %1038 = vst.msk [vmem:[#allocation4] sm:$0xff] %vm993_vm7, %v1037_v50 }
 0x566   : > { %v1039_v51 = vld [vmem:[#allocation4] sm:$0xff] }
 0x567   : > { %v1040_v52 = vpack.c.bf16 %v1039_v51, %v1039_v51 }
 0x569   : > { %1358 = vmatmul.mubr.msk.bf16.vlgmr.msra.gmra.mxu1 %vm352_vm4, %v1040_v52 }
 0x629   : > { %v1095_v53 = vpop.f32.mrf.mxu1 }
 0x62a   : > { %1101 = vst.msk [vmem:[%s307_s8] sm:$0xff] %vm352_vm4, %v1095_v53 }
 0x62b   : > { %v1359_v54 = vpop.f32.mrf.mxu1 }
 0x62c   : > { %1478 = shalt.err (!%p1475_p5)
}
 0x62d   : > { %s1479_s25 = scalar_lea.hbm %s1831_s14, 128  ;;  %s1483_s9 = scalar_lea.hbm %s1883_s5, 256 }
 0x62e   : > { %p1480_p6 = scmp.ne.s32.totalorder %s1831_s14, %s1479_s25  ;;  %p1484_p10 = scmp.lt.s32.totalorder %s1831_s14, %s1883_s5 }
 0x62f   : > { %p1485_p11 = scmp.lt.s32.totalorder %s1483_s9, %s1479_s25 }
 0x630   : > { %p1481_p7 = pnand %p1480_p6, %p1624_p4 }
 0x631   : > { %p1486_p12 = por %p1485_p11, %p1484_p10 }
 0x632   : > { %p1482_p9 = pneg %p1481_p7 }
 0x634   : > { %p1487_p13 = pnand %p1486_p12, %p1482_p9 }
 0x636   : > { %1490 = shalt.err (!%p1487_p13)
}
 0x637   : > { %1361 = dma.vmem_to_hbm [thread:$0]  (%p1624_p4), %s1833_s11, 128, %s1831_s14, %s1103_s15   ;;  %v1098_v55 = vpop.f32.mrf.mxu1 }
 0x639   : > { %v1360_v56 = vpop.f32.mrf.mxu1 }
 0x63a PF: > { %p1367_p0 = scmp.ge.s32.totalorder %s1541_s23, 2  ;;  %s1129_s8 = sand.u32 1, %s1521_s18  }
 0x63b   : > { %s1130_s12 = scalar_lea.sflag [#allocation6], %s1129_s8 }
 0x63c   : > { %p1364_p1 = pnand %p1367_p0, %p1631_p8 }
 0x63e   : > { %p1365_p2 = pneg %p1364_p1 }
 0x640   : > { %1516 = dma.done.wait (%p1365_p2), %s1130_s12, 128  }
 0x641   : > { %1518 = vsyncadd (%p1365_p2), %s1130_s12, 4294967168  ;;  %s18_s23 = sadd.s32 1, %s1541_s23   ;;  %s1886_s18 = smov %s1525_s19 }
 0x642   : > { %p15_p3 = scmp.ge.s32.totalorder %s18_s23, 4   ;;  %s1887_s19 = smov %s1529_s20 }
 0x643   : > { %s1888_s20 = smov %s1637_s6  ;;  %s1889_s21 = smov %s1537_s22 }
 0x644   : > { %s1890_s22 = smov %s1892_s26  ;;  %17 = sbr.rel (!%p15_p3) target bundleno = 4 (0x4), region = 101 }
 0x649   :  { %1135 = vsyncpa [#allocation6], 1 }
 0x64a   :  { %1137 = vsyncpa [#allocation6 + $0x1], 1 }

</bundles_post_ra>
